<compile_context>
chip_gen: v7x
topology: tpu7x:2x2x1
jax: 0.10.0
libtpu: 0.0.40
codegen_flags: <defaults>
</compile_context>

<pallas_src>
import jax
import jax.numpy as jnp
from jax.experimental import pallas as pl
from jax.experimental.pallas import tpu as pltpu

X_DIM = 32     # ref_enc_gru_size
Z_DIM = 16     # encoder_embedding_dim
Y_DIM = 8      # n_accent_classes
HID = 512      # hidden width of the two MLP stacks
BATCH = 2
TEMPERATURE = 1.0

TILE_B = 8                         # f32 sublane tile = batch tile
ACT_COLS = 64                      # [x(32) | gumbel_u(8) | gauss(16) | pad]
OUT_COLS = 128                     # [z|mu|var|ymu|yvar|prob|logits|pad] lane-dense
W3_K = 64                          # q(z|x,y) input padded 40 -> 64 (zero rows)
# TODO(synk): hard=True Gumbel straight-through (argmax one-hot scatter) not
# implemented; the module's forward default is hard=0 (soft), reproduced here.


def _softplus(v):
    # numerically-stable softplus (single exp), matches F.softplus(beta=1)
    return jnp.maximum(v, 0.0) + jnp.log1p(jnp.exp(-jnp.abs(v)))


def _softmax(v):
    m = jnp.max(v, axis=-1, keepdims=True)
    e = jnp.exp(v - m)
    return e / jnp.sum(e, axis=-1, keepdims=True)   # exact divide (DMA-bound)


def gmvae_kernel(act_ref, w1, w2, wl, w3, w4, wh, wyh, b_ref, out_ref):
    act = act_ref[...]                                   # (TILE_B, 64) f32
    rows = act.shape[0]
    x = act[:, 0:X_DIM]                                  # (B, 32)
    u = act[:, X_DIM:X_DIM + Y_DIM]                      # (B, 8) gumbel uniform
    noise = act[:, X_DIM + Y_DIM:X_DIM + Y_DIM + Z_DIM]  # (B, 16) gaussian

    # bias/scale slab (7, 512) f32:
    #   rows 0..3 = b1,b2,b3,b4 ; row 4 = small biases ; rows 5,6 = s2,s4 scales
    b1 = b_ref[0:1, :]
    b2 = b_ref[1:2, :]
    b3 = b_ref[2:3, :]
    b4 = b_ref[3:4, :]
    b_small = b_ref[4:5, :]
    bl = b_small[:, 0:Y_DIM]                                   # logits bias
    b_head = b_small[:, Y_DIM:Y_DIM + 2 * Z_DIM]               # [bmu | bvar]
    by_head = b_small[:, Y_DIM + 2 * Z_DIM:Y_DIM + 4 * Z_DIM]  # [bymu | byvar]
    s2 = b_ref[5:6, :]                                         # w2 per-col scale
    s4 = b_ref[6:7, :]                                         # w4 per-col scale

    def dot_bf16(a, w_ref_):
        # bf16 MXU operands, f32 accumulation
        return jnp.dot(a.astype(jnp.bfloat16), w_ref_[...],
                       preferred_element_type=jnp.float32)

    def dot_q8(a, w_ref_, scale):
        # int8 weight -> bf16 (exact for |q|<=127), matmul, scale after f32 acc
        w = w_ref_[...].astype(jnp.float32).astype(jnp.bfloat16)
        acc = jnp.dot(a.astype(jnp.bfloat16), w,
                      preferred_element_type=jnp.float32)
        return acc * scale

    # ---- q(y|x): Linear->ReLU->Linear(int8)->ReLU->GumbelSoftmax head ----
    h1 = jnp.maximum(dot_bf16(x, w1) + b1, 0.0)
    h2 = jnp.maximum(dot_q8(h1, w2, s2) + b2, 0.0)
    logits = dot_bf16(h2, wl) + bl
    prob = _softmax(logits)
    # gumbel noise: -log(-log(U + eps) + eps), eps = 1e-20 (kept in f32)
    g = -jnp.log(-jnp.log(u + 1e-20) + 1e-20)
    y = _softmax((logits + g) / TEMPERATURE)

    # ---- q(z|x,y): 64-wide [x | y | 0] operand (w3 K padded with zero rows) ----
    xy = jnp.concatenate(
        [x, y, jnp.zeros((rows, W3_K - X_DIM - Y_DIM), jnp.float32)], axis=1)
    h3 = jnp.maximum(dot_bf16(xy, w3) + b3, 0.0)
    h4 = jnp.maximum(dot_q8(h3, w4, s4) + b4, 0.0)
    head = dot_bf16(h4, wh) + b_head                     # (B, 32) = [mu | var]
    mu = head[:, 0:Z_DIM]
    var = _softplus(head[:, Z_DIM:2 * Z_DIM])
    # reparameterize: z = mu + noise * sqrt(var + 1e-10)   (f32)
    z = mu + noise * jnp.sqrt(var + 1e-10)

    # ---- p(z|y): fused ymu||yvar head (tiny; MXU cost is noise here) ----
    yhead = dot_bf16(y, wyh) + by_head                   # (B, 32)
    ymu = yhead[:, 0:Z_DIM]
    yvar = _softplus(yhead[:, Z_DIM:2 * Z_DIM])

    # ---- single lane-dense output slab (unmasked store, one writeback DMA) ----
    pad = jnp.zeros((rows, OUT_COLS - 5 * Z_DIM - 2 * Y_DIM), jnp.float32)
    out_ref[...] = jnp.concatenate([z, mu, var, ymu, yvar, prob, logits, pad],
                                   axis=1)


def _quantize_int8_percol(w):
    """Symmetric per-output-column int8 quantization; returns (q, scale)."""
    amax = jnp.max(jnp.abs(w), axis=0, keepdims=True)          # (1, out)
    scale = jnp.where(amax > 0, amax / 127.0, 1.0).astype(jnp.float32)
    q = jnp.clip(jnp.round(w / scale), -127.0, 127.0).astype(jnp.int8)
    return q, scale


def init_params(key):
    """Xavier-normal weights (matches torch.nn.init.xavier_normal_), zero bias.

    w2/w4 are int8 (per-column scales in the bias slab); other weights are bf16.
    This is a deliberate precision trade vs. the f32 PyTorch reference.
    """
    def xavier(k, shape):
        fan_in, fan_out = shape
        std = (2.0 / (fan_in + fan_out)) ** 0.5
        return jax.random.normal(k, shape, jnp.float32) * std

    ks = jax.random.split(key, 9)
    w1 = xavier(ks[0], (X_DIM, HID))
    w2 = xavier(ks[1], (HID, HID))
    wl = xavier(ks[2], (HID, Y_DIM))
    w3 = xavier(ks[3], (X_DIM + Y_DIM, HID))      # Linear(x_dim + y_dim, 512)
    w4 = xavier(ks[4], (HID, HID))
    wmu = xavier(ks[5], (HID, Z_DIM))
    wvar = xavier(ks[6], (HID, Z_DIM))
    wymu = xavier(ks[7], (Y_DIM, Z_DIM))
    wyvar = xavier(ks[8], (Y_DIM, Z_DIM))

    w_head = jnp.concatenate([wmu, wvar], axis=1)       # (HID, 2*Z_DIM)
    wy_head = jnp.concatenate([wymu, wyvar], axis=1)    # (Y_DIM, 2*Z_DIM)
    # pad w3's K (40 -> 64) with zero rows so the xy operand is 64-wide/aligned
    w3_pad = jnp.zeros((W3_K, HID), jnp.float32).at[:X_DIM + Y_DIM, :].set(w3)

    w2_q, s2 = _quantize_int8_percol(w2)
    w4_q, s4 = _quantize_int8_percol(w4)

    # All biases are zero (init.constant_(m.bias, 0)); slab layout:
    #   rows 0..3: b1, b2, b3, b4 (each HID wide)
    #   row 4:     [bl(0:8) | bmu||bvar(8:40) | bymu||byvar(40:72) | zeros]
    #   rows 5,6:  per-column dequant scales for w2, w4
    bias_scale = jnp.zeros((7, HID), jnp.float32)
    bias_scale = bias_scale.at[5, :].set(s2[0])
    bias_scale = bias_scale.at[6, :].set(s4[0])

    bf = lambda a: a.astype(jnp.bfloat16)
    return {
        "w1": bf(w1), "w2": w2_q, "wl": bf(wl), "w3": bf(w3_pad), "w4": w4_q,
        "w_head": bf(w_head), "wy_head": bf(wy_head), "bias_scale": bias_scale,
    }


def gmvae_forward(x, params, gumbel_u, gauss_noise):
    """Returns (z, (z, mu, var, y_mu, y_var, prob, logits)) like GMVAENet.forward."""
    b = x.shape[0]
    x_flat = x.reshape(b, -1).astype(jnp.float32)        # x.view(B, -1)
    assert x_flat.shape[1] == X_DIM

    # pad batch to the f32 sublane tile (8 rows); extra rows are zeros and
    # produce finite (discarded) results.  Single concat + single pad.
    pb = max(TILE_B, ((b + TILE_B - 1) // TILE_B) * TILE_B)
    act = jnp.concatenate([x_flat, gumbel_u.astype(jnp.float32),
                           gauss_noise.astype(jnp.float32)], axis=1)
    act = jnp.pad(act, ((0, pb - b), (0, ACT_COLS - act.shape[1])))

    def wspec(shape):
        # full-array block, constant index_map -> DMA'd once, VMEM-resident
        return pl.BlockSpec(shape, lambda i: (0, 0))

    in_specs = [
        pl.BlockSpec((TILE_B, ACT_COLS), lambda i: (i, 0)),     # act tiles
        wspec((X_DIM, HID)),            # w1   bf16
        wspec((HID, HID)),              # w2   int8
        wspec((HID, Y_DIM)),            # wl   bf16
        wspec((W3_K, HID)),             # w3   bf16 (K padded to 64)
        wspec((HID, HID)),              # w4   int8
        wspec((HID, 2 * Z_DIM)),        # w_head  bf16
        wspec((Y_DIM, 2 * Z_DIM)),      # wy_head bf16
        wspec((7, HID)),                # bias / scale slab f32
    ]

    # Footprint: ~0.66 MiB weights (int8 w2/w4 + bf16 rest) + tiny activation
    # tiles — fits every generation.  If HID is scaled up, tile w2/w4 over K
    # with an "arbitrary" grid axis + f32 VMEM accumulator, sized against
    # v7x's 64 MiB VMEM (not v5e/v6e's 128 MiB).
    out_slab = pl.pallas_call(
        gmvae_kernel,
        out_shape=jax.ShapeDtypeStruct((pb, OUT_COLS), jnp.float32),
        grid=(pb // TILE_B,),
        in_specs=in_specs,
        out_specs=pl.BlockSpec((TILE_B, OUT_COLS), lambda i: (i, 0)),
        compiler_params=pltpu.CompilerParams(
            dimension_semantics=("parallel",),     # split batch tiles across TCs (v7x)
            vmem_limit_bytes=32 * 1024 * 1024),
    )(act, params["w1"], params["w2"], params["wl"], params["w3"],
      params["w4"], params["w_head"], params["wy_head"], params["bias_scale"])

    z = out_slab[:b, 0:Z_DIM]
    mu = out_slab[:b, Z_DIM:2 * Z_DIM]
    var = out_slab[:b, 2 * Z_DIM:3 * Z_DIM]
    y_mu = out_slab[:b, 3 * Z_DIM:4 * Z_DIM]
    y_var = out_slab[:b, 4 * Z_DIM:5 * Z_DIM]
    prob = out_slab[:b, 5 * Z_DIM:5 * Z_DIM + Y_DIM]
    logits = out_slab[:b, 5 * Z_DIM + Y_DIM:5 * Z_DIM + 2 * Y_DIM]
    return z, (z, mu, var, y_mu, y_var, prob, logits)


def gmvae_reference(x_flat, params, gumbel_u, gauss_noise):
    """Pure-JAX mirror of the kernel math (same bf16/int8 precision choices)."""
    def mm(a, w):
        return jnp.dot(a.astype(jnp.bfloat16), w.astype(jnp.bfloat16),
                       preferred_element_type=jnp.float32)
    b = params["bias_scale"]
    b1, b2, b3, b4, small = b[0:1], b[1:2], b[2:3], b[3:4], b[4:5]
    bl = small[:, 0:Y_DIM]
    b_head = small[:, Y_DIM:Y_DIM + 2 * Z_DIM]
    by_head = small[:, Y_DIM + 2 * Z_DIM:Y_DIM + 4 * Z_DIM]
    s2, s4 = b[5:6], b[6:7]

    h1 = jnp.maximum(mm(x_flat, params["w1"]) + b1, 0.0)
    h2 = jnp.maximum(mm(h1, params["w2"].astype(jnp.float32)) * s2 + b2, 0.0)
    logits = mm(h2, params["wl"]) + bl
    prob = jax.nn.softmax(logits, axis=-1)
    g = -jnp.log(-jnp.log(gumbel_u + 1e-20) + 1e-20)
    y = jax.nn.softmax((logits + g) / TEMPERATURE, axis=-1)
    xy = jnp.concatenate([x_flat, y], axis=1)
    h3 = jnp.maximum(mm(xy, params["w3"][:X_DIM + Y_DIM]) + b3, 0.0)
    h4 = jnp.maximum(mm(h3, params["w4"].astype(jnp.float32)) * s4 + b4, 0.0)
    head = mm(h4, params["w_head"]) + b_head
    mu = head[:, 0:Z_DIM]
    var = jax.nn.softplus(head[:, Z_DIM:2 * Z_DIM])
    z = mu + gauss_noise * jnp.sqrt(var + 1e-10)
    yhead = mm(y, params["wy_head"]) + by_head
    y_mu = yhead[:, 0:Z_DIM]
    y_var = jax.nn.softplus(yhead[:, Z_DIM:2 * Z_DIM])
    return z, mu, var, y_mu, y_var, prob, logits


if __name__ == "__main__":
    key = jax.random.PRNGKey(0)
    k_param, k_x, k_gumbel, k_gauss = jax.random.split(key, 4)

    # params built once, device-resident, reused across calls
    params = init_params(k_param)
    # input activation (already flat, like ref_enc_gru output): (batch, x_dim)
    x = jax.random.normal(k_x, (BATCH, X_DIM), jnp.float32)
    # noise generated outside the kernel (torch.rand / torch.randn equivalents)
    gumbel_u = jax.random.uniform(k_gumbel, (BATCH, Y_DIM), jnp.float32)
    gauss_noise = jax.random.normal(k_gauss, (BATCH, Z_DIM), jnp.float32)

    fwd = jax.jit(gmvae_forward)
    out = fwd(x, params, gumbel_u, gauss_noise)
    out = jax.block_until_ready(out)

    z, (z2, mu, var, y_mu, y_var, prob, logits) = out
    assert z.shape == (BATCH, Z_DIM)
    assert mu.shape == (BATCH, Z_DIM) and var.shape == (BATCH, Z_DIM)
    assert y_mu.shape == (BATCH, Z_DIM) and y_var.shape == (BATCH, Z_DIM)
    assert prob.shape == (BATCH, Y_DIM) and logits.shape == (BATCH, Y_DIM)
    assert bool(jnp.all(jnp.isfinite(z)))
    assert bool(jnp.all(jnp.isfinite(logits)))
    # exact softmax divide -> rows sum to 1 tightly
    assert bool(jnp.allclose(jnp.sum(prob, axis=-1), 1.0, atol=1e-5))
    # var / y_var are softplus outputs -> strictly positive
    assert bool(jnp.all(var > 0)) and bool(jnp.all(y_var > 0))

    # compare against pure-JAX reference using the same quantized params
    ref = gmvae_reference(x.reshape(BATCH, -1).astype(jnp.float32),
                          params, gumbel_u, gauss_noise)
    for got, want in zip((z, mu, var, y_mu, y_var, prob, logits), ref):
        assert bool(jnp.allclose(got, want, atol=3e-2, rtol=3e-2)), (got, want)

    print("KERNEL_OK")
</pallas_src>

<mosaic_0001>
module attributes {stable_mosaic.version = 11 : i64} {
  func.func @gmvae_kernel(%arg0: i32, %arg1: memref<8x64xf32, #tpu.memory_space<vmem>>, %arg2: memref<32x512xbf16, #tpu.memory_space<vmem>>, %arg3: memref<512x512xi8, #tpu.memory_space<vmem>>, %arg4: memref<512x8xbf16, #tpu.memory_space<vmem>>, %arg5: memref<64x512xbf16, #tpu.memory_space<vmem>>, %arg6: memref<512x512xi8, #tpu.memory_space<vmem>>, %arg7: memref<512x32xbf16, #tpu.memory_space<vmem>>, %arg8: memref<8x32xbf16, #tpu.memory_space<vmem>>, %arg9: memref<7x512xf32, #tpu.memory_space<vmem>>, %arg10: memref<8x128xf32, #tpu.memory_space<vmem>>) attributes {dimension_semantics = [#tpu.dimension_semantics<parallel>], iteration_bounds = array<i64: 1>, scalar_prefetch = 0 : i64, scratch_operands = 0 : i64, tpu.core_type = #tpu.core_type<tc>, window_params = [{transform_indices = @transform_0, window_bounds = array<i64: 8, 64>}, {pipeline_mode = #tpu.pipeline_mode<synchronous>, transform_indices = @transform_1, window_bounds = array<i64: 32, 512>}, {pipeline_mode = #tpu.pipeline_mode<synchronous>, transform_indices = @transform_2, window_bounds = array<i64: 512, 512>}, {pipeline_mode = #tpu.pipeline_mode<synchronous>, transform_indices = @transform_3, window_bounds = array<i64: 512, 8>}, {pipeline_mode = #tpu.pipeline_mode<synchronous>, transform_indices = @transform_4, window_bounds = array<i64: 64, 512>}, {pipeline_mode = #tpu.pipeline_mode<synchronous>, transform_indices = @transform_5, window_bounds = array<i64: 512, 512>}, {pipeline_mode = #tpu.pipeline_mode<synchronous>, transform_indices = @transform_6, window_bounds = array<i64: 512, 32>}, {pipeline_mode = #tpu.pipeline_mode<synchronous>, transform_indices = @transform_7, window_bounds = array<i64: 8, 32>}, {pipeline_mode = #tpu.pipeline_mode<synchronous>, transform_indices = @transform_8, window_bounds = array<i64: 7, 512>}, {transform_indices = @transform_9, window_bounds = array<i64: 8, 128>}]} {
    %c0 = arith.constant 0 : index
    %c0_0 = arith.constant 0 : index
    %0 = vector.load %arg1[%c0, %c0_0] : memref<8x64xf32, #tpu.memory_space<vmem>>, vector<8x64xf32>
    %1 = vector.extract_strided_slice %0 {offsets = [0, 0], sizes = [8, 32], strides = [1, 1]} : vector<8x64xf32> to vector<8x32xf32>
    %2 = vector.extract_strided_slice %0 {offsets = [0, 32], sizes = [8, 8], strides = [1, 1]} : vector<8x64xf32> to vector<8x8xf32>
    %3 = vector.extract_strided_slice %0 {offsets = [0, 40], sizes = [8, 16], strides = [1, 1]} : vector<8x64xf32> to vector<8x16xf32>
    %c0_1 = arith.constant 0 : index
    %c0_2 = arith.constant 0 : index
    %4 = vector.load %arg9[%c0_1, %c0_2] : memref<7x512xf32, #tpu.memory_space<vmem>>, vector<1x512xf32>
    %c1 = arith.constant 1 : index
    %c0_3 = arith.constant 0 : index
    %5 = vector.load %arg9[%c1, %c0_3] : memref<7x512xf32, #tpu.memory_space<vmem>>, vector<1x512xf32>
    %c2 = arith.constant 2 : index
    %c0_4 = arith.constant 0 : index
    %6 = vector.load %arg9[%c2, %c0_4] : memref<7x512xf32, #tpu.memory_space<vmem>>, vector<1x512xf32>
    %c3 = arith.constant 3 : index
    %c0_5 = arith.constant 0 : index
    %7 = vector.load %arg9[%c3, %c0_5] : memref<7x512xf32, #tpu.memory_space<vmem>>, vector<1x512xf32>
    %c4 = arith.constant 4 : index
    %c0_6 = arith.constant 0 : index
    %8 = vector.load %arg9[%c4, %c0_6] : memref<7x512xf32, #tpu.memory_space<vmem>>, vector<1x512xf32>
    %9 = vector.extract_strided_slice %8 {offsets = [0, 0], sizes = [1, 8], strides = [1, 1]} : vector<1x512xf32> to vector<1x8xf32>
    %10 = vector.extract_strided_slice %8 {offsets = [0, 8], sizes = [1, 32], strides = [1, 1]} : vector<1x512xf32> to vector<1x32xf32>
    %11 = vector.extract_strided_slice %8 {offsets = [0, 40], sizes = [1, 32], strides = [1, 1]} : vector<1x512xf32> to vector<1x32xf32>
    %c5 = arith.constant 5 : index
    %c0_7 = arith.constant 0 : index
    %12 = vector.load %arg9[%c5, %c0_7] : memref<7x512xf32, #tpu.memory_space<vmem>>, vector<1x512xf32>
    %c6 = arith.constant 6 : index
    %c0_8 = arith.constant 0 : index
    %13 = vector.load %arg9[%c6, %c0_8] : memref<7x512xf32, #tpu.memory_space<vmem>>, vector<1x512xf32>
    %14 = arith.truncf %1 : vector<8x32xf32> to vector<8x32xbf16>
    %c0_9 = arith.constant 0 : index
    %c0_10 = arith.constant 0 : index
    %15 = vector.load %arg2[%c0_9, %c0_10] : memref<32x512xbf16, #tpu.memory_space<vmem>>, vector<32x512xbf16>
    %cst = arith.constant dense<0.000000e+00> : vector<8x512xf32>
    %16 = tpu.matmul %14, %15, %cst {dimension_numbers = #tpu.dot_dimension_numbers<[1], [0], [0], [1], [0, 0, 1, 1], [], []>} : vector<8x32xbf16>, vector<32x512xbf16>, vector<8x512xf32> -> vector<8x512xf32>
    %17 = vector.broadcast %4 : vector<1x512xf32> to vector<8x512xf32>
    %18 = arith.addf %16, %17 : vector<8x512xf32>
    %cst_11 = arith.constant 0.000000e+00 : f32
    %19 = vector.broadcast %cst_11 : f32 to vector<8x512xf32>
    %20 = arith.maximumf %18, %19 : vector<8x512xf32>
    %c0_12 = arith.constant 0 : index
    %c0_13 = arith.constant 0 : index
    %21 = vector.load %arg3[%c0_12, %c0_13] : memref<512x512xi8, #tpu.memory_space<vmem>>, vector<512x512xi8>
    %22 = arith.sitofp %21 : vector<512x512xi8> to vector<512x512xf32>
    %23 = arith.truncf %22 : vector<512x512xf32> to vector<512x512xbf16>
    %24 = arith.truncf %20 : vector<8x512xf32> to vector<8x512xbf16>
    %cst_14 = arith.constant dense<0.000000e+00> : vector<8x512xf32>
    %25 = tpu.matmul %24, %23, %cst_14 {dimension_numbers = #tpu.dot_dimension_numbers<[1], [0], [0], [1], [0, 0, 1, 1], [], []>} : vector<8x512xbf16>, vector<512x512xbf16>, vector<8x512xf32> -> vector<8x512xf32>
    %26 = vector.broadcast %12 : vector<1x512xf32> to vector<8x512xf32>
    %27 = arith.mulf %25, %26 : vector<8x512xf32>
    %28 = vector.broadcast %5 : vector<1x512xf32> to vector<8x512xf32>
    %29 = arith.addf %27, %28 : vector<8x512xf32>
    %cst_15 = arith.constant 0.000000e+00 : f32
    %30 = vector.broadcast %cst_15 : f32 to vector<8x512xf32>
    %31 = arith.maximumf %29, %30 : vector<8x512xf32>
    %32 = arith.truncf %31 : vector<8x512xf32> to vector<8x512xbf16>
    %c0_16 = arith.constant 0 : index
    %c0_17 = arith.constant 0 : index
    %33 = vector.load %arg4[%c0_16, %c0_17] : memref<512x8xbf16, #tpu.memory_space<vmem>>, vector<512x8xbf16>
    %cst_18 = arith.constant dense<0.000000e+00> : vector<8x8xf32>
    %34 = tpu.matmul %32, %33, %cst_18 {dimension_numbers = #tpu.dot_dimension_numbers<[1], [0], [0], [1], [0, 0, 1, 1], [], []>} : vector<8x512xbf16>, vector<512x8xbf16>, vector<8x8xf32> -> vector<8x8xf32>
    %35 = vector.broadcast %9 : vector<1x8xf32> to vector<8x8xf32>
    %36 = arith.addf %34, %35 : vector<8x8xf32>
    %cst_19 = arith.constant dense<0xFF800000> : vector<8xf32>
    %37 = vector.multi_reduction <maximumf>, %36, %cst_19 [1] : vector<8x8xf32> to vector<8xf32>
    %38 = vector.shape_cast %37 : vector<8xf32> to vector<8x1xf32>
    %39 = vector.broadcast %38 : vector<8x1xf32> to vector<8x8xf32>
    %40 = arith.subf %36, %39 : vector<8x8xf32>
    %41 = math.exp %40 : vector<8x8xf32>
    %cst_20 = arith.constant dense<0.000000e+00> : vector<8xf32>
    %42 = vector.multi_reduction <add>, %41, %cst_20 [1] : vector<8x8xf32> to vector<8xf32>
    %43 = vector.shape_cast %42 : vector<8xf32> to vector<8x1xf32>
    %44 = vector.broadcast %43 : vector<8x1xf32> to vector<8x8xf32>
    %45 = arith.divf %41, %44 : vector<8x8xf32>
    %cst_21 = arith.constant 9.99999968E-21 : f32
    %46 = vector.broadcast %cst_21 : f32 to vector<8x8xf32>
    %47 = arith.addf %2, %46 : vector<8x8xf32>
    %48 = math.log %47 : vector<8x8xf32>
    %cst_22 = arith.constant 0.000000e+00 : f32
    %49 = vector.broadcast %cst_22 : f32 to vector<8x8xf32>
    %50 = arith.subf %49, %48 : vector<8x8xf32>
    %cst_23 = arith.constant 9.99999968E-21 : f32
    %51 = vector.broadcast %cst_23 : f32 to vector<8x8xf32>
    %52 = arith.addf %50, %51 : vector<8x8xf32>
    %53 = math.log %52 : vector<8x8xf32>
    %cst_24 = arith.constant 0.000000e+00 : f32
    %54 = vector.broadcast %cst_24 : f32 to vector<8x8xf32>
    %55 = arith.subf %54, %53 : vector<8x8xf32>
    %56 = arith.addf %36, %55 : vector<8x8xf32>
    %cst_25 = arith.constant 1.000000e+00 : f32
    %57 = vector.broadcast %cst_25 : f32 to vector<8x8xf32>
    %58 = arith.divf %56, %57 : vector<8x8xf32>
    %cst_26 = arith.constant dense<0xFF800000> : vector<8xf32>
    %59 = vector.multi_reduction <maximumf>, %58, %cst_26 [1] : vector<8x8xf32> to vector<8xf32>
    %60 = vector.shape_cast %59 : vector<8xf32> to vector<8x1xf32>
    %61 = vector.broadcast %60 : vector<8x1xf32> to vector<8x8xf32>
    %62 = arith.subf %58, %61 : vector<8x8xf32>
    %63 = math.exp %62 : vector<8x8xf32>
    %cst_27 = arith.constant dense<0.000000e+00> : vector<8xf32>
    %64 = vector.multi_reduction <add>, %63, %cst_27 [1] : vector<8x8xf32> to vector<8xf32>
    %65 = vector.shape_cast %64 : vector<8xf32> to vector<8x1xf32>
    %66 = vector.broadcast %65 : vector<8x1xf32> to vector<8x8xf32>
    %67 = arith.divf %63, %66 : vector<8x8xf32>
    %cst_28 = arith.constant 0.000000e+00 : f32
    %68 = vector.broadcast %cst_28 : f32 to vector<8x24xf32>
    %69 = tpu.concatenate %1, %67, %68 in 1 : vector<8x32xf32>, vector<8x8xf32>, vector<8x24xf32> -> vector<8x64xf32>
    %70 = arith.truncf %69 : vector<8x64xf32> to vector<8x64xbf16>
    %c0_29 = arith.constant 0 : index
    %c0_30 = arith.constant 0 : index
    %71 = vector.load %arg5[%c0_29, %c0_30] : memref<64x512xbf16, #tpu.memory_space<vmem>>, vector<64x512xbf16>
    %cst_31 = arith.constant dense<0.000000e+00> : vector<8x512xf32>
    %72 = tpu.matmul %70, %71, %cst_31 {dimension_numbers = #tpu.dot_dimension_numbers<[1], [0], [0], [1], [0, 0, 1, 1], [], []>} : vector<8x64xbf16>, vector<64x512xbf16>, vector<8x512xf32> -> vector<8x512xf32>
    %73 = vector.broadcast %6 : vector<1x512xf32> to vector<8x512xf32>
    %74 = arith.addf %72, %73 : vector<8x512xf32>
    %cst_32 = arith.constant 0.000000e+00 : f32
    %75 = vector.broadcast %cst_32 : f32 to vector<8x512xf32>
    %76 = arith.maximumf %74, %75 : vector<8x512xf32>
    %c0_33 = arith.constant 0 : index
    %c0_34 = arith.constant 0 : index
    %77 = vector.load %arg6[%c0_33, %c0_34] : memref<512x512xi8, #tpu.memory_space<vmem>>, vector<512x512xi8>
    %78 = arith.sitofp %77 : vector<512x512xi8> to vector<512x512xf32>
    %79 = arith.truncf %78 : vector<512x512xf32> to vector<512x512xbf16>
    %80 = arith.truncf %76 : vector<8x512xf32> to vector<8x512xbf16>
    %cst_35 = arith.constant dense<0.000000e+00> : vector<8x512xf32>
    %81 = tpu.matmul %80, %79, %cst_35 {dimension_numbers = #tpu.dot_dimension_numbers<[1], [0], [0], [1], [0, 0, 1, 1], [], []>} : vector<8x512xbf16>, vector<512x512xbf16>, vector<8x512xf32> -> vector<8x512xf32>
    %82 = vector.broadcast %13 : vector<1x512xf32> to vector<8x512xf32>
    %83 = arith.mulf %81, %82 : vector<8x512xf32>
    %84 = vector.broadcast %7 : vector<1x512xf32> to vector<8x512xf32>
    %85 = arith.addf %83, %84 : vector<8x512xf32>
    %cst_36 = arith.constant 0.000000e+00 : f32
    %86 = vector.broadcast %cst_36 : f32 to vector<8x512xf32>
    %87 = arith.maximumf %85, %86 : vector<8x512xf32>
    %88 = arith.truncf %87 : vector<8x512xf32> to vector<8x512xbf16>
    %c0_37 = arith.constant 0 : index
    %c0_38 = arith.constant 0 : index
    %89 = vector.load %arg7[%c0_37, %c0_38] : memref<512x32xbf16, #tpu.memory_space<vmem>>, vector<512x32xbf16>
    %cst_39 = arith.constant dense<0.000000e+00> : vector<8x32xf32>
    %90 = tpu.matmul %88, %89, %cst_39 {dimension_numbers = #tpu.dot_dimension_numbers<[1], [0], [0], [1], [0, 0, 1, 1], [], []>} : vector<8x512xbf16>, vector<512x32xbf16>, vector<8x32xf32> -> vector<8x32xf32>
    %91 = vector.broadcast %10 : vector<1x32xf32> to vector<8x32xf32>
    %92 = arith.addf %90, %91 : vector<8x32xf32>
    %93 = vector.extract_strided_slice %92 {offsets = [0, 0], sizes = [8, 16], strides = [1, 1]} : vector<8x32xf32> to vector<8x16xf32>
    %94 = vector.extract_strided_slice %92 {offsets = [0, 16], sizes = [8, 16], strides = [1, 1]} : vector<8x32xf32> to vector<8x16xf32>
    %cst_40 = arith.constant 0.000000e+00 : f32
    %95 = vector.broadcast %cst_40 : f32 to vector<8x16xf32>
    %96 = arith.maximumf %94, %95 : vector<8x16xf32>
    %97 = math.absf %94 : vector<8x16xf32>
    %cst_41 = arith.constant 0.000000e+00 : f32
    %98 = vector.broadcast %cst_41 : f32 to vector<8x16xf32>
    %99 = arith.subf %98, %97 : vector<8x16xf32>
    %100 = math.exp %99 : vector<8x16xf32>
    %101 = math.log1p %100 : vector<8x16xf32>
    %102 = arith.addf %96, %101 : vector<8x16xf32>
    %cst_42 = arith.constant 1.000000e-10 : f32
    %103 = vector.broadcast %cst_42 : f32 to vector<8x16xf32>
    %104 = arith.addf %102, %103 : vector<8x16xf32>
    %105 = math.sqrt %104 : vector<8x16xf32>
    %106 = arith.mulf %3, %105 : vector<8x16xf32>
    %107 = arith.addf %93, %106 : vector<8x16xf32>
    %108 = arith.truncf %67 : vector<8x8xf32> to vector<8x8xbf16>
    %c0_43 = arith.constant 0 : index
    %c0_44 = arith.constant 0 : index
    %109 = vector.load %arg8[%c0_43, %c0_44] : memref<8x32xbf16, #tpu.memory_space<vmem>>, vector<8x32xbf16>
    %cst_45 = arith.constant dense<0.000000e+00> : vector<8x32xf32>
    %110 = tpu.matmul %108, %109, %cst_45 {dimension_numbers = #tpu.dot_dimension_numbers<[1], [0], [0], [1], [0, 0, 1, 1], [], []>} : vector<8x8xbf16>, vector<8x32xbf16>, vector<8x32xf32> -> vector<8x32xf32>
    %111 = vector.broadcast %11 : vector<1x32xf32> to vector<8x32xf32>
    %112 = arith.addf %110, %111 : vector<8x32xf32>
    %113 = vector.extract_strided_slice %112 {offsets = [0, 0], sizes = [8, 16], strides = [1, 1]} : vector<8x32xf32> to vector<8x16xf32>
    %114 = vector.extract_strided_slice %112 {offsets = [0, 16], sizes = [8, 16], strides = [1, 1]} : vector<8x32xf32> to vector<8x16xf32>
    %cst_46 = arith.constant 0.000000e+00 : f32
    %115 = vector.broadcast %cst_46 : f32 to vector<8x16xf32>
    %116 = arith.maximumf %114, %115 : vector<8x16xf32>
    %117 = math.absf %114 : vector<8x16xf32>
    %cst_47 = arith.constant 0.000000e+00 : f32
    %118 = vector.broadcast %cst_47 : f32 to vector<8x16xf32>
    %119 = arith.subf %118, %117 : vector<8x16xf32>
    %120 = math.exp %119 : vector<8x16xf32>
    %121 = math.log1p %120 : vector<8x16xf32>
    %122 = arith.addf %116, %121 : vector<8x16xf32>
    %cst_48 = arith.constant 0.000000e+00 : f32
    %123 = vector.broadcast %cst_48 : f32 to vector<8x32xf32>
    %124 = tpu.concatenate %107, %93, %102, %113, %122, %45, %36, %123 in 1 : vector<8x16xf32>, vector<8x16xf32>, vector<8x16xf32>, vector<8x16xf32>, vector<8x16xf32>, vector<8x8xf32>, vector<8x8xf32>, vector<8x32xf32> -> vector<8x128xf32>
    %c0_49 = arith.constant 0 : index
    %c0_50 = arith.constant 0 : index
    %125 = vector.load %arg10[%c0_49, %c0_50] : memref<8x128xf32, #tpu.memory_space<vmem>>, vector<8x128xf32>
    tpu.vector_store %arg10[%c0_49, %c0_50], %124 {strides = array<i32>} : memref<8x128xf32, #tpu.memory_space<vmem>>, vector<8x128xf32>,
    return
  }
  func.func @transform_0(%arg0: i32) -> (i32, i32) {
    %c0_i32 = arith.constant 0 : i32
    %c0_i32_0 = arith.constant 0 : i32
    return %arg0, %c0_i32 : i32, i32
  }
  func.func @transform_1(%arg0: i32) -> (i32, i32) {
    %c0_i32 = arith.constant 0 : i32
    %c0_i32_0 = arith.constant 0 : i32
    %c0_i32_1 = arith.constant 0 : i32
    return %c0_i32, %c0_i32_0 : i32, i32
  }
  func.func @transform_2(%arg0: i32) -> (i32, i32) {
    %c0_i32 = arith.constant 0 : i32
    %c0_i32_0 = arith.constant 0 : i32
    %c0_i32_1 = arith.constant 0 : i32
    return %c0_i32, %c0_i32_0 : i32, i32
  }
  func.func @transform_3(%arg0: i32) -> (i32, i32) {
    %c0_i32 = arith.constant 0 : i32
    %c0_i32_0 = arith.constant 0 : i32
    %c0_i32_1 = arith.constant 0 : i32
    return %c0_i32, %c0_i32_0 : i32, i32
  }
  func.func @transform_4(%arg0: i32) -> (i32, i32) {
    %c0_i32 = arith.constant 0 : i32
    %c0_i32_0 = arith.constant 0 : i32
    %c0_i32_1 = arith.constant 0 : i32
    return %c0_i32, %c0_i32_0 : i32, i32
  }
  func.func @transform_5(%arg0: i32) -> (i32, i32) {
    %c0_i32 = arith.constant 0 : i32
    %c0_i32_0 = arith.constant 0 : i32
    %c0_i32_1 = arith.constant 0 : i32
    return %c0_i32, %c0_i32_0 : i32, i32
  }
  func.func @transform_6(%arg0: i32) -> (i32, i32) {
    %c0_i32 = arith.constant 0 : i32
    %c0_i32_0 = arith.constant 0 : i32
    %c0_i32_1 = arith.constant 0 : i32
    return %c0_i32, %c0_i32_0 : i32, i32
  }
  func.func @transform_7(%arg0: i32) -> (i32, i32) {
    %c0_i32 = arith.constant 0 : i32
    %c0_i32_0 = arith.constant 0 : i32
    %c0_i32_1 = arith.constant 0 : i32
    return %c0_i32, %c0_i32_0 : i32, i32
  }
  func.func @transform_8(%arg0: i32) -> (i32, i32) {
    %c0_i32 = arith.constant 0 : i32
    %c0_i32_0 = arith.constant 0 : i32
    %c0_i32_1 = arith.constant 0 : i32
    return %c0_i32, %c0_i32_0 : i32, i32
  }
  func.func @transform_9(%arg0: i32) -> (i32, i32) {
    %c0_i32 = arith.constant 0 : i32
    %c0_i32_0 = arith.constant 0 : i32
    return %arg0, %c0_i32 : i32, i32
  }
}

</mosaic_0001>

<bundles_post_ra>
// kernel: gmvae_forward.1
= control target key start
LH: loop header
LB: loop body
LE: loop exit
PB: predicated region body
PF: predicated region fallthrough
CT: control target
= control target key end

     0   :  { %14 = vsyncpa [#allocation3], 0  ;;  %s3188_s0 = inlined_call_operand.vmem [shape: f32[8,64], index: 0, kind: input, shape index: {}]   ;;  %s3189_s1 = inlined_call_operand.vmem [shape: bf16[32,512], index: 1, kind: input, shape index: {}]   ;;  %s3190_s2 = inlined_call_operand.vmem [shape: s8[512,512], index: 2, kind: input, shape index: {}]   ;;  %s3191_s3 = inlined_call_operand.vmem [shape: bf16[512,8], index: 3, kind: input, shape index: {}]   ;;  %s3192_s4 = inlined_call_operand.hbm [shape: bf16[64,512], index: 4, kind: input, shape index: {}]   ;;  %s3193_s5 = inlined_call_operand.hbm [shape: s8[512,512], index: 5, kind: input, shape index: {}]   ;;  %s3194_s6 = inlined_call_operand.vmem [shape: bf16[512,32], index: 6, kind: input, shape index: {}]   ;;  %s3195_s7 = inlined_call_operand.vmem [shape: bf16[8,32], index: 7, kind: input, shape index: {}]   ;;  %s3196_s8 = inlined_call_operand.vmem [shape: f32[7,512], index: 8, kind: input, shape index: {}]   ;;  %s3197_s9 = inlined_call_operand.vmem [shape: f32[8,128], index: 9, kind: output, shape index: {}]  }
   0x1   :  { %15 = vsyncpa [#allocation5], 0  ;;  %s2544_s30 = smov [#allocation2]   ;;  %s2496_s13 = scalar_lea.hbm %s3192_s4, 2048 }
   0x2   :  { %s29_s10 = sshll.u32 %s2544_s30, 4  ;;  %p2497_p0 = scmp.ne.s32.totalorder %s3192_s4, %s2496_s13  ;;  %s30_s10 = int_to_ptr.vmem [resolvable:$true] %s29_s10 }
   0x3   :  { %p2500_p1 = scmp.lt.u32.totalorder %s2496_s13, %s3192_s4 }
   0x5   :  { %p2502_p2 = pnand %p2500_p1, %p2497_p0 }
   0x7   :  { %2505 = shalt.err (!%p2502_p2)
}
   0x8   :  { %s2506_s18 = scalar_lea.vmem %s30_s10, 2048  ;;  %p2511_p4 = scmp.lt.s32.totalorder %s30_s10, %s30_s10 }
   0x9   :  { %p2507_p3 = scmp.ne.s32.totalorder %s30_s10, %s2506_s18  ;;  %p2512_p5 = scmp.lt.s32.totalorder %s2506_s18, %s2506_s18 }
   0xb   :  { %p2513_p6 = por %p2512_p5, %p2511_p4 }
   0xd   :  { %p2514_p7 = pnand %p2513_p6, %p2507_p3 }
   0xf   :  { %2517 = shalt.err (!%p2514_p7)
}
  0x10   :  { %s2545_s19 = smov 256   ;;  %s2546_s20 = smov 16  }
  0x11   :  { %35 = dma.hbm_to_vmem [thread:$0]  %s3192_s4, 2048, %s30_s10, [#allocation3], %s2545_s19, %s2545_s19, %s2546_s20  }
  0x12   :  { %s2547_s23 = smov [#allocation4]   ;;  %s2518_s27 = scalar_lea.hbm %s3193_s5, 8192 }
  0x13   :  { %s41_s24 = sshll.u32 %s2547_s23, 4  ;;  %p2519_p8 = scmp.ne.s32.totalorder %s3193_s5, %s2518_s27  ;;  %s42_s24 = int_to_ptr.vmem [resolvable:$true] %s41_s24 }
  0x14   :  { %p2522_p9 = scmp.lt.u32.totalorder %s2518_s27, %s3193_s5 }
  0x16   :  { %p2524_p10 = pnand %p2522_p9, %p2519_p8 }
  0x18   :  { %2527 = shalt.err (!%p2524_p10)
}
  0x19   :  { %s2528_s12 = scalar_lea.vmem %s42_s24, 8192  ;;  %p2533_p12 = scmp.lt.s32.totalorder %s42_s24, %s42_s24 }
  0x1a   :  { %p2529_p11 = scmp.ne.s32.totalorder %s42_s24, %s2528_s12  ;;  %p2534_p13 = scmp.lt.s32.totalorder %s2528_s12, %s2528_s12 }
  0x1c   :  { %p2535_p0 = por %p2534_p13, %p2533_p12 }
  0x1e   :  { %p2536_p1 = pnand %p2535_p0, %p2529_p11 }
  0x20   :  { %2539 = shalt.err (!%p2536_p1)
}
  0x21   :  { %s2548_s4 = smov 512   ;;  %s2549_s10 = smov 32  }
  0x22   :  { %47 = dma.hbm_to_vmem [thread:$0]  %s3193_s5, 8192, %s42_s24, [#allocation5], %s2548_s4, %s2548_s4, %s2549_s10  }
  0x23   :  { %2540 = dma.done.wait [#allocation3], 2048  }
  0x24   :  { %2541 = vsyncadd [#allocation3], 4294965248 }
  0x25   :  { %2542 = dma.done.wait [#allocation5], 8192  }
  0x26   :  { %2543 = vsyncadd [#allocation5], 4294959104  ;;  %v2550_v0 = vmov 0   ;;  %v2372_v1 = vld [vmem:[%s3189_s1 + $0x4] ss:$16 sps:$4 sm:$0xff]   ;;  %v236_v9 = vld [vmem:[%s3190_s2 + $0x8] sm:$0xff] }
  0x27   :  { %181 = vmatprep.mubr.bf16.mxu0 %v2550_v0  ;;  %222 = vmatprep.mubr.bf16.mxu1 %v2550_v0  ;;  %v2374_v2 = vld [vmem:[%s3189_s1] ss:$16 sps:$4 sm:$0xff]   ;;  %v2375_v3 = vld [vmem:[%s3189_s1 + $0x24] ss:$16 sps:$4 sm:$0xff]   ;;  %v2378_v6 = vld [vmem:[%s3189_s1 + $0xc] ss:$16 sps:$4 sm:$0xff]   ;;  %v300_v12 = vunpack.c.l.s8.bf16 %v236_v9  ;;  %v304_v18 = vunpack.c.h.s8.bf16 %v236_v9 }
  0x28   :  { %149 = vmatprep.subr.bf16.mxu0 %v2372_v1  ;;  %v2377_v4 = vld [vmem:[%s3189_s1 + $0x20] ss:$16 sps:$4 sm:$0xff]   ;;  %v2380_v7 = vld [vmem:[%s3189_s1 + $0x8] ss:$16 sps:$4 sm:$0xff]   ;;  %190 = vmatprep.subr.bf16.mxu1 %v2378_v6  ;;  %v2381_v8 = vld [vmem:[%s3189_s1 + $0x2c] ss:$16 sps:$4 sm:$0xff]  }
  0x29   :  { %v61_v5 = vld [vmem:[%s3188_s0] sm:$0xff]  ;;  %150 = vmatpush1.bf16.msra.mxu0 %v2374_v2  ;;  %191 = vmatpush1.bf16.msra.mxu1 %v2380_v7  ;;  %v2383_v11 = vld [vmem:[%s3189_s1 + $0x28] ss:$16 sps:$4 sm:$0xff]   ;;  %vm145_vm0 = vcmask 261120   ;;  %v237_v17 = vld [vmem:[%s3190_s2 + $0x10] sm:$0xff]  ;;  %vm995_vm1 = vcmask 64512  }
  0x2a   :  { %151 = vmatprep.subr.bf16.mxu0 %v2375_v3  ;;  %v75_v10 = vpack.c.bf16 %v61_v5, %v61_v5  ;;  %v238_v13 = vld [vmem:[%s3190_s2 + $0x18] sm:$0xff]  ;;  %v235_v14 = vld [vmem:[%s3190_s2] sm:$0xff]  ;;  %192 = vmatprep.subr.bf16.mxu1 %v2381_v8  ;;  %v240_v19 = vld [vmem:[%s3190_s2 + $0x28] sm:$0xff]  ;;  %v301_v20 = vunpack.c.l.s8.bf16 %v237_v17  ;;  %v305_v26 = vunpack.c.h.s8.bf16 %v237_v17  ;;  %s2552_s4 = smov 88   ;;  %s2553_s13 = smov 120   ;;  %vm1036_vm2 = vcmask 326656  }
  0x2b   :  { %v302_v15 = vunpack.c.l.s8.bf16 %v238_v13  ;;  %v299_v16 = vunpack.c.l.s8.bf16 %v235_v14  ;;  %v306_v21 = vunpack.c.h.s8.bf16 %v238_v13  ;;  %v303_v22 = vunpack.c.h.s8.bf16 %v235_v14  ;;  %v242_v24 = vld [vmem:[%s3190_s2 + $0x38] sm:$0xff]  ;;  %v239_v25 = vld [vmem:[%s3190_s2 + $0x20] sm:$0xff]  ;;  %v241_v27 = vld [vmem:[%s3190_s2 + $0x30] sm:$0xff]  ;;  %s2558_s14 = smov 80  }
  0x2c   :  { %v308_v23 = vunpack.c.l.s8.bf16 %v240_v19  ;;  %v310_v28 = vunpack.c.l.s8.bf16 %v242_v24  ;;  %v307_v29 = vunpack.c.l.s8.bf16 %v239_v25  ;;  %v244_v30 = vld [vmem:[%s3190_s2 + $0x48] sm:$0xff]  ;;  %v312_v31 = vunpack.c.h.s8.bf16 %v240_v19  ;;  %v246_v33 = vld [vmem:[%s3190_s2 + $0x58] sm:$0xff]  ;;  %v243_v34 = vld [vmem:[%s3190_s2 + $0x40] sm:$0xff] }
  0x2d   :  { %152 = vmatpush1.bf16.msra.mxu0 %v2377_v4  ;;  %193 = vmatpush1.bf16.msra.mxu1 %v2383_v11  ;;  %v309_v32 = vunpack.c.l.s8.bf16 %v241_v27  ;;  %v314_v35 = vunpack.c.h.s8.bf16 %v242_v24  ;;  %v311_v36 = vunpack.c.h.s8.bf16 %v239_v25  ;;  %v316_v37 = vunpack.c.l.s8.bf16 %v244_v30  ;;  %v245_v38 = vld [vmem:[%s3190_s2 + $0x50] sm:$0xff]  ;;  %v248_v42 = vld [vmem:[%s3190_s2 + $0x68] sm:$0xff]  ;;  %v250_v45 = vld [vmem:[%s3190_s2 + $0x78] sm:$0xff] }
  0x2e   :  { %431 = vmatprep.subr.bf16.mxu0 %v300_v12  ;;  %513 = vmatprep.subr.bf16.mxu1 %v302_v15  ;;  %v313_v39 = vunpack.c.h.s8.bf16 %v241_v27  ;;  %v318_v40 = vunpack.c.l.s8.bf16 %v246_v33  ;;  %v315_v41 = vunpack.c.l.s8.bf16 %v243_v34  ;;  %v320_v43 = vunpack.c.h.s8.bf16 %v244_v30  ;;  %v247_v46 = vld [vmem:[%s3190_s2 + $0x60] sm:$0xff]  ;;  %v249_v50 = vld [vmem:[%s3190_s2 + $0x70] sm:$0xff]  ;;  %v252_v54 = vld [vmem:[%s3190_s2 + $0x88] sm:$0xff] }
  0x2f   :  { %v317_v44 = vunpack.c.l.s8.bf16 %v245_v38  ;;  %v322_v47 = vunpack.c.h.s8.bf16 %v246_v33  ;;  %v319_v48 = vunpack.c.h.s8.bf16 %v243_v34  ;;  %v324_v49 = vunpack.c.l.s8.bf16 %v248_v42  ;;  %v254_v57 = vld [vmem:[%s3190_s2 + $0x98] sm:$0xff]  ;;  %v251_v58 = vld [vmem:[%s3190_s2 + $0x80] sm:$0xff]  ;;  %v253_v62 = vld [vmem:[%s3190_s2 + $0x90] sm:$0xff] }
  0x30   :  { %2160 = vmatmul.mubr.msk.bf16.vlgmr.msra.gmra.mrb[0].mxu0 %vm145_vm0, %v75_v10  ;;  %2161 = vmatmul.mubr.msk.bf16.vlgmr.msra.gmra.mrb[0].mxu1 %vm145_vm0, %v75_v10  ;;  %v321_v51 = vunpack.c.h.s8.bf16 %v245_v38  ;;  %v326_v52 = vunpack.c.l.s8.bf16 %v250_v45  ;;  %v323_v53 = vunpack.c.l.s8.bf16 %v247_v46  ;;  %v328_v55 = vunpack.c.h.s8.bf16 %v248_v42  ;;  %v256_v3 = vld [vmem:[%s3190_s2 + $0xa8] sm:$0xff]  ;;  %v258_v6 = vld [vmem:[%s3190_s2 + $0xb8] sm:$0xff]  ;;  %v255_v7 = vld [vmem:[%s3190_s2 + $0xa0] sm:$0xff] }
  0x31   :  { %432 = vmatpush1.bf16.msra.mxu0 %v299_v16  ;;  %514 = vmatpush1.bf16.msra.mxu1 %v301_v20  ;;  %v325_v56 = vunpack.c.l.s8.bf16 %v249_v50  ;;  %v330_v59 = vunpack.c.h.s8.bf16 %v250_v45  ;;  %v327_v60 = vunpack.c.h.s8.bf16 %v247_v46  ;;  %v332_v61 = vunpack.c.l.s8.bf16 %v252_v54  ;;  %v257_v11 = vld [vmem:[%s3190_s2 + $0xb0] sm:$0xff]  ;;  %v260_v15 = vld [vmem:[%s3190_s2 + $0xc8] sm:$0xff]  ;;  %v259_v19 = vld [vmem:[%s3190_s2 + $0xc0] sm:$0xff] }
  0x32   :  { %433 = vmatprep.subr.bf16.mxu0 %v304_v18  ;;  %515 = vmatprep.subr.bf16.mxu1 %v306_v21  ;;  %v329_v63 = vunpack.c.h.s8.bf16 %v249_v50  ;;  %v334_v1 = vunpack.c.l.s8.bf16 %v254_v57  ;;  %v331_v2 = vunpack.c.l.s8.bf16 %v251_v58  ;;  %v336_v4 = vunpack.c.h.s8.bf16 %v252_v54  ;;  %v262_v18 = vld [vmem:[%s3190_s2 + $0xd8] sm:$0xff] }
  0x33   :  { %v333_v5 = vunpack.c.l.s8.bf16 %v253_v62  ;;  %v338_v8 = vunpack.c.h.s8.bf16 %v254_v57  ;;  %v335_v9 = vunpack.c.h.s8.bf16 %v251_v58  ;;  %v340_v10 = vunpack.c.l.s8.bf16 %v256_v3  ;;  %v266_v33 = vld [vmem:[%s3190_s2 + $0xf8] sm:$0xff] }
  0x34   :  { %v337_v12 = vunpack.c.h.s8.bf16 %v253_v62  ;;  %v342_v13 = vunpack.c.l.s8.bf16 %v258_v6  ;;  %v339_v14 = vunpack.c.l.s8.bf16 %v255_v7  ;;  %v344_v16 = vunpack.c.h.s8.bf16 %v256_v3  ;;  %v270_v45 = vld [vmem:[%s3190_s2 + $0x118] sm:$0xff] }
  0x35   :  { %434 = vmatpush1.bf16.msra.mxu0 %v303_v22  ;;  %516 = vmatpush1.bf16.msra.mxu1 %v305_v26  ;;  %v341_v17 = vunpack.c.l.s8.bf16 %v257_v11  ;;  %v346_v20 = vunpack.c.h.s8.bf16 %v258_v6  ;;  %v343_v21 = vunpack.c.h.s8.bf16 %v255_v7  ;;  %v348_v22 = vunpack.c.l.s8.bf16 %v260_v15 }
  0x36   :  { %435 = vmatprep.subr.bf16.mxu0 %v308_v23  ;;  %517 = vmatprep.subr.bf16.mxu1 %v310_v28  ;;  %v261_v23 = vld [vmem:[%s3190_s2 + $0xd0] sm:$0xff]  ;;  %v345_v24 = vunpack.c.h.s8.bf16 %v257_v11  ;;  %v350_v25 = vunpack.c.l.s8.bf16 %v262_v18  ;;  %v347_v26 = vunpack.c.l.s8.bf16 %v259_v19  ;;  %v352_v27 = vunpack.c.h.s8.bf16 %v260_v15 }
  0x37   :  { %v349_v28 = vunpack.c.l.s8.bf16 %v261_v23  ;;  %v351_v30 = vunpack.c.h.s8.bf16 %v259_v19  ;;  %vm1156_vm3 = vcmask 523264   ;;  %vm2044_vm4 = vcmask 1043456  }
  0x38   :  { %vm2555_vm5 = vmmov 0   ;;  %vm2127_vm10 = vcmask 130048   ;;  %vm2130_vm11 = vcmask 392192   ;;  %vm2133_vm12 = vcmask 654336  }
  0x39   :  { %436 = vmatpush1.bf16.msra.mxu0 %v307_v29  ;;  %518 = vmatpush1.bf16.msra.mxu1 %v309_v32  ;;  %v354_v29 = vunpack.c.h.s8.bf16 %v262_v18  ;;  %v264_v32 = vld [vmem:[%s3190_s2 + $0xe8] sm:$0xff]  ;;  %vm2135_vm13 = vcmask 719872   ;;  %vm2137_vm14 = vcmask 785408  }
  0x3a   :  { %437 = vmatprep.subr.bf16.mxu0 %v312_v31  ;;  %519 = vmatprep.subr.bf16.mxu1 %v314_v35  ;;  %v353_v31 = vunpack.c.h.s8.bf16 %v261_v23  ;;  %v356_v34 = vunpack.c.l.s8.bf16 %v264_v32  ;;  %v358_v35 = vunpack.c.l.s8.bf16 %v266_v33  ;;  %v271_v23 = vld [vmem:[%s3190_s2 + $0x120] sm:$0xff] }
  0x3d   :  { %438 = vmatpush1.bf16.msra.mxu0 %v311_v36  ;;  %520 = vmatpush1.bf16.msra.mxu1 %v313_v39  ;;  %v263_v36 = vld [vmem:[%s3190_s2 + $0xe0] sm:$0xff] }
  0x3e   :  { %439 = vmatprep.subr.bf16.mxu0 %v316_v37  ;;  %521 = vmatprep.subr.bf16.mxu1 %v318_v40  ;;  %v265_v37 = vld [vmem:[%s3190_s2 + $0xf0] sm:$0xff]  ;;  %v355_v38 = vunpack.c.l.s8.bf16 %v263_v36  ;;  %v360_v40 = vunpack.c.h.s8.bf16 %v264_v32  ;;  %v359_v42 = vunpack.c.h.s8.bf16 %v263_v36 }
  0x3f   :  { %v357_v39 = vunpack.c.l.s8.bf16 %v265_v37  ;;  %v277_v36 = vld [vmem:[%s3190_s2 + $0x150] sm:$0xff] }
  0x41   :  { %440 = vmatpush1.bf16.msra.mxu0 %v315_v41  ;;  %522 = vmatpush1.bf16.msra.mxu1 %v317_v44  ;;  %v362_v41 = vunpack.c.h.s8.bf16 %v266_v33  ;;  %v268_v44 = vld [vmem:[%s3190_s2 + $0x108] sm:$0xff] }
  0x42   :  { %441 = vmatprep.subr.bf16.mxu0 %v320_v43  ;;  %523 = vmatprep.subr.bf16.mxu1 %v322_v47  ;;  %v361_v43 = vunpack.c.h.s8.bf16 %v265_v37  ;;  %v364_v46 = vunpack.c.l.s8.bf16 %v268_v44  ;;  %v366_v47 = vunpack.c.l.s8.bf16 %v270_v45 }
  0x45   :  { %442 = vmatpush1.bf16.msra.mxu0 %v319_v48  ;;  %524 = vmatpush1.bf16.msra.mxu1 %v321_v51  ;;  %v85_v48 = vlaneseq  ;;  %v2776_v51 = vld [vmem:[%s3196_s8] ss:$8 sm:$0xf] }
  0x46   :  { %443 = vmatprep.subr.bf16.mxu0 %v324_v49  ;;  %525 = vmatprep.subr.bf16.mxu1 %v326_v52 }
  0x47   :  { %v2768_v49 = vshrl.u32 %v85_v48, 7  ;;  %v281_v48 = vld [vmem:[%s3190_s2 + $0x170] sm:$0xff] }
  0x49   :  { %444 = vmatpush1.bf16.msra.mxu0 %v323_v53  ;;  %526 = vmatpush1.bf16.msra.mxu1 %v325_v56  ;;  %v2771_v50 = vsub.s32 0, %v2768_v49  ;;  %v2779_v52 = vsub.s32 1, %v2768_v49  ;;  %v2784_v54 = vsub.s32 3, %v2768_v49 }
  0x4a   :  { %445 = vmatprep.subr.bf16.mxu0 %v328_v55  ;;  %527 = vmatprep.subr.bf16.mxu1 %v330_v59 }
  0x4b   :  { %v88_v53 = vrot.slane %v2776_v51, %v2771_v50  ;;  %v92_v55 = vrot.slane %v2776_v51, %v2779_v52  ;;  %v100_v59 = vrot.slane %v2776_v51, %v2784_v54 }
  0x4d   :  { %446 = vmatpush1.bf16.msra.mxu0 %v327_v60  ;;  %528 = vmatpush1.bf16.msra.mxu1 %v329_v63 }
  0x4e   :  { %447 = vmatprep.subr.bf16.mxu0 %v332_v61  ;;  %529 = vmatprep.subr.bf16.mxu1 %v334_v1  ;;  %v267_v1 = vld [vmem:[%s3190_s2 + $0x100] sm:$0xff] }
  0x4f   :  { %v367_v19 = vunpack.c.h.s8.bf16 %v267_v1 }
  0x51   :  { %448 = vmatpush1.bf16.msra.mxu0 %v331_v2  ;;  %530 = vmatpush1.bf16.msra.mxu1 %v333_v5  ;;  %v269_v2 = vld [vmem:[%s3190_s2 + $0x110] sm:$0xff] }
  0x52   :  { %449 = vmatprep.subr.bf16.mxu0 %v336_v4  ;;  %531 = vmatprep.subr.bf16.mxu1 %v338_v8 }
  0x55   :  { %450 = vmatpush1.bf16.msra.mxu0 %v335_v9  ;;  %532 = vmatpush1.bf16.msra.mxu1 %v337_v12  ;;  %v363_v9 = vunpack.c.l.s8.bf16 %v267_v1  ;;  %v283_v1 = vld [vmem:[%s3190_s2 + $0x180] sm:$0xff] }
  0x56   :  { %451 = vmatprep.subr.bf16.mxu0 %v340_v10  ;;  %533 = vmatprep.subr.bf16.mxu1 %v342_v13  ;;  %v365_v10 = vunpack.c.l.s8.bf16 %v269_v2  ;;  %v368_v13 = vunpack.c.h.s8.bf16 %v268_v44  ;;  %v385_v44 = vunpack.c.h.s8.bf16 %v277_v36 }
  0x59   :  { %452 = vmatpush1.bf16.msra.mxu0 %v339_v14  ;;  %534 = vmatpush1.bf16.msra.mxu1 %v341_v17  ;;  %v370_v14 = vunpack.c.h.s8.bf16 %v270_v45  ;;  %v274_v17 = vld [vmem:[%s3190_s2 + $0x138] sm:$0xff] }
  0x5a   :  { %453 = vmatprep.subr.bf16.mxu0 %v344_v16  ;;  %535 = vmatprep.subr.bf16.mxu1 %v346_v20  ;;  %v272_v16 = vld [vmem:[%s3190_s2 + $0x128] sm:$0xff]  ;;  %v369_v20 = vunpack.c.h.s8.bf16 %v269_v2  ;;  %v285_v2 = vld [vmem:[%s3190_s2 + $0x190] sm:$0xff] }
  0x5d   :  { %454 = vmatpush1.bf16.msra.mxu0 %v343_v21  ;;  %536 = vmatpush1.bf16.msra.mxu1 %v345_v24  ;;  %v372_v21 = vunpack.c.l.s8.bf16 %v272_v16  ;;  %v273_v24 = vld [vmem:[%s3190_s2 + $0x130] sm:$0xff] }
  0x5e   :  { %455 = vmatprep.subr.bf16.mxu0 %v348_v22  ;;  %537 = vmatprep.subr.bf16.mxu1 %v350_v25  ;;  %v374_v22 = vunpack.c.l.s8.bf16 %v274_v17  ;;  %v371_v25 = vunpack.c.l.s8.bf16 %v271_v23  ;;  %v377_v32 = vunpack.c.h.s8.bf16 %v273_v24 }
  0x61   :  { %456 = vmatpush1.bf16.msra.mxu0 %v347_v26  ;;  %538 = vmatpush1.bf16.msra.mxu1 %v349_v28  ;;  %v373_v26 = vunpack.c.l.s8.bf16 %v273_v24  ;;  %v378_v28 = vunpack.c.h.s8.bf16 %v274_v17 }
  0x62   :  { %457 = vmatprep.subr.bf16.mxu0 %v352_v27  ;;  %539 = vmatprep.subr.bf16.mxu1 %v354_v29  ;;  %v376_v27 = vunpack.c.h.s8.bf16 %v272_v16  ;;  %v276_v29 = vld [vmem:[%s3190_s2 + $0x148] sm:$0xff] }
  0x63   :  { %v380_v33 = vunpack.c.l.s8.bf16 %v276_v29 }
  0x65   :  { %458 = vmatpush1.bf16.msra.mxu0 %v351_v30  ;;  %540 = vmatpush1.bf16.msra.mxu1 %v353_v31  ;;  %v278_v30 = vld [vmem:[%s3190_s2 + $0x158] sm:$0xff]  ;;  %v375_v31 = vunpack.c.h.s8.bf16 %v271_v23 }
  0x66   :  { %459 = vmatprep.subr.bf16.mxu0 %v356_v34  ;;  %541 = vmatprep.subr.bf16.mxu1 %v358_v35  ;;  %v382_v34 = vunpack.c.l.s8.bf16 %v278_v30  ;;  %v275_v35 = vld [vmem:[%s3190_s2 + $0x140] sm:$0xff] }
  0x67   :  { %v379_v37 = vunpack.c.l.s8.bf16 %v275_v35 }
  0x69   :  { %460 = vmatpush1.bf16.msra.mxu0 %v355_v38  ;;  %542 = vmatpush1.bf16.msra.mxu1 %v357_v39  ;;  %v381_v38 = vunpack.c.l.s8.bf16 %v277_v36  ;;  %v384_v39 = vunpack.c.h.s8.bf16 %v276_v29 }
  0x6a   :  { %461 = vmatprep.subr.bf16.mxu0 %v360_v40  ;;  %543 = vmatprep.subr.bf16.mxu1 %v362_v41  ;;  %v386_v40 = vunpack.c.h.s8.bf16 %v278_v30  ;;  %v280_v41 = vld [vmem:[%s3190_s2 + $0x168] sm:$0xff]  ;;  %v2871_v30 = vsub.s32 2, %v2768_v49 }
  0x6b   :  { %v388_v45 = vunpack.c.l.s8.bf16 %v280_v41 }
  0x6d   :  { %462 = vmatpush1.bf16.msra.mxu0 %v359_v42  ;;  %544 = vmatpush1.bf16.msra.mxu1 %v361_v43  ;;  %v282_v42 = vld [vmem:[%s3190_s2 + $0x178] sm:$0xff]  ;;  %v383_v43 = vunpack.c.h.s8.bf16 %v275_v35 }
  0x6e   :  { %472 = vmatprep.subr.bf16.mxu0 %v364_v46  ;;  %554 = vmatprep.subr.bf16.mxu1 %v366_v47  ;;  %v390_v46 = vunpack.c.l.s8.bf16 %v282_v42  ;;  %v279_v47 = vld [vmem:[%s3190_s2 + $0x160] sm:$0xff] }
 0x103   :  { %v183_v56 = vpop.f32.mrb[0].mxu0  ;;  %v2796_v3 = vpop.f32.mrb[0].mxu1 }
 0x104   :  { %v184_v57 = vadd.f32 %v183_v56, %v88_v53  ;;  %v185_v58 = vpop.f32.mrb[1].mxu0  ;;  %v226_v5 = vpop.f32.mrb[1].mxu1  ;;  %v387_v53 = vunpack.c.l.s8.bf16 %v279_v47  ;;  %v392_v56 = vunpack.c.h.s8.bf16 %v280_v41 }
 0x105   :  { %v186_v60 = vadd.f32 %v185_v58, %v92_v55  ;;  %v187_v61 = vpop.f32.mrb[2].mxu0  ;;  %v227_v6 = vadd.f32 %v226_v5, %v100_v59  ;;  %v228_v7 = vpop.f32.mrb[2].mxu1  ;;  %v389_v55 = vunpack.c.l.s8.bf16 %v281_v48  ;;  %v284_v58 = vld [vmem:[%s3190_s2 + $0x188] sm:$0xff]  ;;  %v286_v59 = vld [vmem:[%s3190_s2 + $0x198] sm:$0xff]  ;;  %v397_v5 = vunpack.c.l.s8.bf16 %v285_v2 }
 0x106   :  { %v231_v62 = vmax.f32 %v184_v57, 0.0  ;;  %v188_v63 = vpop.f32.mrb[3].mxu0  ;;  %v229_v11 = vpop.f32.mrb[3].mxu1  ;;  %v394_v57 = vunpack.c.h.s8.bf16 %v282_v42  ;;  %v393_v61 = vunpack.c.h.s8.bf16 %v281_v48  ;;  %v402_v7 = vunpack.c.h.s8.bf16 %v286_v59  ;;  %v2384_v48 = vld [vmem:[%s3191_s3 + $0x40] sm:$0xff]  }
 0x107   :  { %v232_v4 = vmax.f32 %v186_v60, 0.0  ;;  %v234_v15 = vmax.f32 %v227_v6, 0.0  ;;  %v391_v60 = vunpack.c.h.s8.bf16 %v279_v47  ;;  %v398_v63 = vunpack.c.l.s8.bf16 %v286_v59  ;;  %v2390_v59 = vld [vmem:[%s3191_s3 + $0x8] sm:$0xff]  }
 0x108   :  { %v427_v12 = vpack.c.bf16 %v231_v62, %v231_v62  ;;  %v396_v62 = vunpack.c.l.s8.bf16 %v284_v58  ;;  %v400_v6 = vunpack.c.h.s8.bf16 %v284_v58  ;;  %v401_v11 = vunpack.c.h.s8.bf16 %v285_v2  ;;  %v2389_v58 = vld [vmem:[%s3191_s3 + $0xc8] sm:$0xff]   ;;  %v2396_v2 = vld [vmem:[%s3191_s3 + $0x58] sm:$0xff]  }
 0x109   :  { %v428_v8 = vpack.c.bf16 %v232_v4, %v232_v4  ;;  %v430_v18 = vpack.c.bf16 %v234_v15, %v234_v15  ;;  %v395_v4 = vunpack.c.l.s8.bf16 %v283_v1  ;;  %v289_v15 = vld [vmem:[%s3190_s2 + $0x1b0] sm:$0xff] }
 0x10a   :  { %v405_v17 = vunpack.c.l.s8.bf16 %v289_v15  ;;  %v409_v23 = vunpack.c.h.s8.bf16 %v289_v15  ;;  %v2408_v15 = vld [vmem:[%s3191_s3 + $0x70] sm:$0xff]  }
 0x10b   :  { %463 = vmatprep.mubr.bf16.mxu0 %v428_v8  ;;  %545 = vmatprep.mubr.bf16.mxu1 %v428_v8  ;;  %v288_v8 = vld [vmem:[%s3190_s2 + $0x1a8] sm:$0xff] }
 0x10c   :  { %464 = vmatmul.mubr.bf16.vlgmr.msra.gmra.mrb[4].mxu0 %v427_v12  ;;  %546 = vmatmul.mubr.bf16.vlgmr.msra.gmra.mrb[4].mxu1 %v427_v12  ;;  %v404_v12 = vunpack.c.l.s8.bf16 %v288_v8 }
 0x10d   :  { %473 = vmatpush1.bf16.msra.mxu0 %v363_v9  ;;  %555 = vmatpush1.bf16.msra.mxu1 %v365_v10  ;;  %v290_v9 = vld [vmem:[%s3190_s2 + $0x1b8] sm:$0xff]  ;;  %v399_v10 = vunpack.c.h.s8.bf16 %v283_v1  ;;  %v2395_v1 = vld [vmem:[%s3191_s3 + $0x90] sm:$0xff]  }
 0x10e   :  { %474 = vmatprep.subr.bf16.mxu0 %v368_v13  ;;  %556 = vmatprep.subr.bf16.mxu1 %v370_v14  ;;  %v406_v13 = vunpack.c.l.s8.bf16 %v290_v9  ;;  %v287_v14 = vld [vmem:[%s3190_s2 + $0x1a0] sm:$0xff] }
 0x10f   :  { %504 = vmatprep.mubr.bf16.mxu0 %v430_v18  ;;  %586 = vmatprep.mubr.bf16.mxu1 %v430_v18  ;;  %v403_v16 = vunpack.c.l.s8.bf16 %v287_v14  ;;  %v408_v18 = vunpack.c.h.s8.bf16 %v288_v8  ;;  %v2401_v8 = vld [vmem:[%s3191_s3 + $0xe0] sm:$0xff]  }
 0x111   :  { %475 = vmatpush1.bf16.msra.mxu0 %v367_v19  ;;  %557 = vmatpush1.bf16.msra.mxu1 %v369_v20  ;;  %v410_v19 = vunpack.c.h.s8.bf16 %v290_v9  ;;  %v292_v20 = vld [vmem:[%s3190_s2 + $0x1c8] sm:$0xff]  ;;  %v2402_v9 = vld [vmem:[%s3191_s3 + $0x20] sm:$0xff]  }
 0x112   :  { %476 = vmatprep.subr.bf16.mxu0 %v372_v21  ;;  %558 = vmatprep.subr.bf16.mxu1 %v374_v22  ;;  %v294_v21 = vld [vmem:[%s3190_s2 + $0x1d8] sm:$0xff]  ;;  %v407_v22 = vunpack.c.h.s8.bf16 %v287_v14  ;;  %v412_v24 = vunpack.c.l.s8.bf16 %v292_v20  ;;  %v2407_v14 = vld [vmem:[%s3191_s3 + $0xa8] sm:$0xff]  }
 0x115   :  { %477 = vmatpush1.bf16.msra.mxu0 %v371_v25  ;;  %559 = vmatpush1.bf16.msra.mxu1 %v373_v26  ;;  %v414_v25 = vunpack.c.l.s8.bf16 %v294_v21  ;;  %v291_v26 = vld [vmem:[%s3190_s2 + $0x1c0] sm:$0xff] }
 0x116   :  { %478 = vmatprep.subr.bf16.mxu0 %v376_v27  ;;  %560 = vmatprep.subr.bf16.mxu1 %v378_v28  ;;  %v293_v27 = vld [vmem:[%s3190_s2 + $0x1d0] sm:$0xff]  ;;  %v411_v28 = vunpack.c.l.s8.bf16 %v291_v26  ;;  %v415_v35 = vunpack.c.h.s8.bf16 %v291_v26 }
 0x117   :  { %v413_v29 = vunpack.c.l.s8.bf16 %v293_v27  ;;  %v417_v36 = vunpack.c.h.s8.bf16 %v293_v27 }
 0x119   :  { %479 = vmatpush1.bf16.msra.mxu0 %v375_v31  ;;  %561 = vmatpush1.bf16.msra.mxu1 %v377_v32  ;;  %v416_v31 = vunpack.c.h.s8.bf16 %v292_v20  ;;  %v418_v32 = vunpack.c.h.s8.bf16 %v294_v21  ;;  %v2413_v20 = vld [vmem:[%s3191_s3 + $0xf8] sm:$0xff]  }
 0x11a   :  { %480 = vmatprep.subr.bf16.mxu0 %v380_v33  ;;  %562 = vmatprep.subr.bf16.mxu1 %v382_v34  ;;  %v296_v33 = vld [vmem:[%s3190_s2 + $0x1e8] sm:$0xff]  ;;  %v298_v34 = vld [vmem:[%s3190_s2 + $0x1f8] sm:$0xff] }
 0x11b   :  { %v420_v49 = vunpack.c.l.s8.bf16 %v296_v33  ;;  %v2414_v21 = vld [vmem:[%s3191_s3 + $0x38] sm:$0xff]  }
 0x11d   :  { %481 = vmatpush1.bf16.msra.mxu0 %v379_v37  ;;  %563 = vmatpush1.bf16.msra.mxu1 %v381_v38  ;;  %v96_v37 = vrot.slane %v2776_v51, %v2871_v30  ;;  %v422_v38 = vunpack.c.l.s8.bf16 %v298_v34  ;;  %v424_v51 = vunpack.c.h.s8.bf16 %v296_v33  ;;  %v2150_v33 = vld [vmem:[%s3196_s8 + $0x5] ss:$8 sm:$0xf] }
 0x11e   :  { %482 = vmatprep.subr.bf16.mxu0 %v384_v39  ;;  %564 = vmatprep.subr.bf16.mxu1 %v386_v40  ;;  %v295_v39 = vld [vmem:[%s3190_s2 + $0x1e0] sm:$0xff]  ;;  %v297_v40 = vld [vmem:[%s3190_s2 + $0x1f0] sm:$0xff]  ;;  %s2557_s2 = smov 24  }
 0x11f   :  { %v419_v41 = vunpack.c.l.s8.bf16 %v295_v39  ;;  %v421_v42 = vunpack.c.l.s8.bf16 %v297_v40 }
 0x121   :  { %483 = vmatpush1.bf16.msra.mxu0 %v383_v43  ;;  %565 = vmatpush1.bf16.msra.mxu1 %v385_v44  ;;  %v225_v43 = vadd.f32 %v2796_v3, %v96_v37  ;;  %v426_v44 = vunpack.c.h.s8.bf16 %v298_v34  ;;  %v2386_v3 = vld [vmem:[%s3191_s3] sm:$0xff]   ;;  %v603_v37 = vrot.slane %v2150_v33, %v2779_v52 }
 0x122   :  { %484 = vmatprep.subr.bf16.mxu0 %v388_v45  ;;  %566 = vmatprep.subr.bf16.mxu1 %v390_v46  ;;  %v423_v45 = vunpack.c.h.s8.bf16 %v295_v39  ;;  %v425_v46 = vunpack.c.h.s8.bf16 %v297_v40  ;;  %v2146_v34 = vld [vmem:[%s3196_s8 + $0x1] ss:$8 sm:$0xf] }
 0x123   :  { %v233_v47 = vmax.f32 %v225_v43, 0.0  ;;  %v632_v39 = vrot.slane %v2146_v34, %v2871_v30  ;;  %v636_v43 = vrot.slane %v2146_v34, %v2784_v54 }
 0x125   :  { %485 = vmatpush1.bf16.msra.mxu0 %v387_v53  ;;  %567 = vmatpush1.bf16.msra.mxu1 %v389_v55  ;;  %v2385_v53 = vld [vmem:[%s3191_s3 + $0xc0] sm:$0xff]  }
 0x126   :  { %486 = vmatprep.subr.bf16.mxu0 %v392_v56  ;;  %568 = vmatprep.subr.bf16.mxu1 %v394_v57  ;;  %v2387_v55 = vld [vmem:[%s3191_s3 + $0x80] sm:$0xff]   ;;  %v429_v56 = vpack.c.bf16 %v233_v47, %v233_v47  ;;  %v2388_v57 = vld [vmem:[%s3191_s3 + $0x48] sm:$0xff]  }
 0x129   :  { %487 = vmatpush1.bf16.msra.mxu0 %v391_v60  ;;  %569 = vmatpush1.bf16.msra.mxu1 %v393_v61  ;;  %v2391_v60 = vld [vmem:[%s3191_s3 + $0x88] sm:$0xff]   ;;  %v2392_v61 = vld [vmem:[%s3191_s3 + $0x50] sm:$0xff]  }
 0x12a   :  { %488 = vmatprep.subr.bf16.mxu0 %v396_v62  ;;  %570 = vmatprep.subr.bf16.mxu1 %v398_v63  ;;  %v2393_v62 = vld [vmem:[%s3191_s3 + $0xd0] sm:$0xff]  }
 0x12b   :  { %v2394_v63 = vld [vmem:[%s3191_s3 + $0x10] sm:$0xff]  }
 0x12d   :  { %489 = vmatpush1.bf16.msra.mxu0 %v395_v4  ;;  %571 = vmatpush1.bf16.msra.mxu1 %v397_v5  ;;  %v2397_v4 = vld [vmem:[%s3191_s3 + $0xd8] sm:$0xff]  }
 0x12e   :  { %490 = vmatprep.subr.bf16.mxu0 %v400_v6  ;;  %572 = vmatprep.subr.bf16.mxu1 %v402_v7  ;;  %v2398_v5 = vld [vmem:[%s3191_s3 + $0x18] sm:$0xff]   ;;  %v2400_v7 = vld [vmem:[%s3191_s3 + $0x60] sm:$0xff]  }
 0x12f   :  { %v2399_v6 = vld [vmem:[%s3191_s3 + $0x98] sm:$0xff]  }
 0x131   :  { %491 = vmatpush1.bf16.msra.mxu0 %v399_v10  ;;  %573 = vmatpush1.bf16.msra.mxu1 %v401_v11  ;;  %v2403_v10 = vld [vmem:[%s3191_s3 + $0xa0] sm:$0xff]   ;;  %v2404_v11 = vld [vmem:[%s3191_s3 + $0x68] sm:$0xff]  }
 0x132   :  { %492 = vmatprep.subr.bf16.mxu0 %v404_v12  ;;  %574 = vmatprep.subr.bf16.mxu1 %v406_v13  ;;  %v2405_v12 = vld [vmem:[%s3191_s3 + $0xe8] sm:$0xff]  }
 0x133   :  { %v2406_v13 = vld [vmem:[%s3191_s3 + $0x28] sm:$0xff]  }
 0x135   :  { %493 = vmatpush1.bf16.msra.mxu0 %v403_v16  ;;  %575 = vmatpush1.bf16.msra.mxu1 %v405_v17  ;;  %v2409_v16 = vld [vmem:[%s3191_s3 + $0xf0] sm:$0xff]  }
 0x136   :  { %494 = vmatprep.subr.bf16.mxu0 %v408_v18  ;;  %576 = vmatprep.subr.bf16.mxu1 %v410_v19  ;;  %v2410_v17 = vld [vmem:[%s3191_s3 + $0x30] sm:$0xff]   ;;  %v2412_v19 = vld [vmem:[%s3191_s3 + $0x78] sm:$0xff]  }
 0x137   :  { %v2411_v18 = vld [vmem:[%s3191_s3 + $0xb0] sm:$0xff]  }
 0x139   :  { %495 = vmatpush1.bf16.msra.mxu0 %v407_v22  ;;  %577 = vmatpush1.bf16.msra.mxu1 %v409_v23  ;;  %v2415_v22 = vld [vmem:[%s3191_s3 + $0xb8] sm:$0xff]   ;;  %v2987_v23 = vld [vmem:[%s3188_s0] sm:$0xff]  ;;  %s2551_s3 = smov 96  }
 0x13a   :  { %496 = vmatprep.subr.bf16.mxu0 %v412_v24  ;;  %578 = vmatprep.subr.bf16.mxu1 %v414_v25  ;;  %v1007_v24 = vadd.f32 1e-20, %v2987_v23 }
 0x13c   :  { %2472 = vlog2.f32 %v1007_v24 }
 0x13d   :  { %497 = vmatpush1.bf16.msra.mxu0 %v411_v28  ;;  %579 = vmatpush1.bf16.msra.mxu1 %v413_v29 }
 0x13e   :  { %498 = vmatprep.subr.bf16.mxu0 %v416_v31  ;;  %580 = vmatprep.subr.bf16.mxu1 %v418_v32 }
 0x141   :  { %499 = vmatpush1.bf16.msra.mxu0 %v415_v35  ;;  %581 = vmatpush1.bf16.msra.mxu1 %v417_v36  ;;  %v599_v35 = vrot.slane %v2150_v33, %v2771_v50  ;;  %v607_v36 = vrot.slane %v2150_v33, %v2871_v30 }
 0x142   :  { %500 = vmatprep.subr.bf16.mxu0 %v420_v49  ;;  %582 = vmatprep.subr.bf16.mxu1 %v422_v38  ;;  %v611_v49 = vrot.slane %v2150_v33, %v2784_v54  ;;  %v624_v38 = vrot.slane %v2146_v34, %v2771_v50  ;;  %v2421_v33 = vld [vmem:[#allocation2 + $0xc] ss:$16 sps:$4 sm:$0xff]  }
 0x145   :  { %501 = vmatpush1.bf16.msra.mxu0 %v419_v41  ;;  %583 = vmatpush1.bf16.msra.mxu1 %v421_v42  ;;  %v628_v42 = vrot.slane %v2146_v34, %v2779_v52  ;;  %v2424_v34 = vld [vmem:[#allocation2 + $0x24] ss:$16 sps:$4 sm:$0xff]  }
 0x146   :  { %502 = vmatprep.subr.bf16.mxu0 %v424_v51  ;;  %584 = vmatprep.subr.bf16.mxu1 %v426_v44  ;;  %v2473_v25 = vpop.eup %2472 }
 0x147   :  { %v1009_v26 = vmul.f32 0.6931472, %v2473_v25 }
 0x149   :  { %503 = vmatpush1.bf16.msra.mxu0 %v423_v45  ;;  %585 = vmatpush1.bf16.msra.mxu1 %v425_v46  ;;  %v1010_v27 = vsub.f32 0.0, %v1009_v26 }
 0x14a   :  { %2245 = vmatprep.subr.bf16.mxu0 %v2384_v48  ;;  %2267 = vmatprep.subr.bf16.mxu1 %v2385_v53 }
 0x14b   :  { %v1011_v28 = vadd.f32 1e-20, %v1010_v27 }
 0x14c   :  { %505 = vmatmul.mubr.bf16.vlgmr.msra.gmra.mrb[4].mxu0 %v429_v56  ;;  %587 = vmatmul.mubr.bf16.vlgmr.msra.gmra.mrb[4].mxu1 %v429_v56 }
 0x14d   :  { %2246 = vmatpush3.bf16.msra.mxu0 %v2386_v3  ;;  %2268 = vmatpush3.bf16.msra.mxu1 %v2387_v55  ;;  %2474 = vlog2.f32 %v1011_v28 }
 0x14e   :  { %2247 = vmatprep.subr.bf16.mxu0 %v2388_v57  ;;  %2269 = vmatprep.subr.bf16.mxu1 %v2389_v58 }
 0x151   :  { %2248 = vmatpush3.bf16.msra.mxu0 %v2390_v59  ;;  %2270 = vmatpush3.bf16.msra.mxu1 %v2391_v60 }
 0x152   :  { %2249 = vmatprep.subr.bf16.mxu0 %v2392_v61  ;;  %2271 = vmatprep.subr.bf16.mxu1 %v2393_v62 }
 0x155   :  { %2250 = vmatpush3.bf16.msra.mxu0 %v2394_v63  ;;  %2272 = vmatpush3.bf16.msra.mxu1 %v2395_v1 }
 0x156   :  { %2251 = vmatprep.subr.bf16.mxu0 %v2396_v2  ;;  %2273 = vmatprep.subr.bf16.mxu1 %v2397_v4 }
 0x157   :  { %v2475_v29 = vpop.eup %2474 }
 0x158   :  { %v1013_v31 = vmul.f32 0.6931472, %v2475_v29  ;;  %v2416_v29 = vld [vmem:[#allocation2] ss:$16 sps:$4 sm:$0xff]  }
 0x159   :  { %2252 = vmatpush3.bf16.msra.mxu0 %v2398_v5  ;;  %2274 = vmatpush3.bf16.msra.mxu1 %v2399_v6 }
 0x15a   :  { %2253 = vmatprep.subr.bf16.mxu0 %v2400_v7  ;;  %2275 = vmatprep.subr.bf16.mxu1 %v2401_v8  ;;  %v1014_v32 = vsub.f32 0.0, %v1013_v31  ;;  %v2149_v7 = vld [vmem:[%s3196_s8 + $0x4] ss:$8 sm:$0xf] }
 0x15b   :  { %v2418_v31 = vld [vmem:[#allocation2 + $0x4] ss:$16 sps:$4 sm:$0xff]  }
 0x15c   :  { %1016 = vrot.lane.b32.xlu0 %v1014_v32, %s2551_s3  ;;  %v2419_v32 = vld [vmem:[#allocation2 + $0x8] ss:$16 sps:$4 sm:$0xff]  }
 0x15d   :  { %2254 = vmatpush3.bf16.msra.mxu0 %v2402_v9  ;;  %2276 = vmatpush3.bf16.msra.mxu1 %v2403_v10  ;;  %v721_v10 = vrot.slane %v2149_v7, %v2771_v50 }
 0x15e   :  { %2255 = vmatprep.subr.bf16.mxu0 %v2404_v11  ;;  %2277 = vmatprep.subr.bf16.mxu1 %v2405_v12 }
 0x161   :  { %2256 = vmatpush3.bf16.msra.mxu0 %v2406_v13  ;;  %2278 = vmatpush3.bf16.msra.mxu1 %v2407_v14 }
 0x162   :  { %2257 = vmatprep.subr.bf16.mxu0 %v2408_v15  ;;  %2279 = vmatprep.subr.bf16.mxu1 %v2409_v16 }
 0x165   :  { %2258 = vmatpush3.bf16.msra.mxu0 %v2410_v17  ;;  %2280 = vmatpush3.bf16.msra.mxu1 %v2411_v18 }
 0x166   :  { %2259 = vmatprep.subr.bf16.mxu0 %v2412_v19  ;;  %2281 = vmatprep.subr.bf16.mxu1 %v2413_v20 }
 0x169   :  { %2260 = vmatpush3.bf16.msra.mxu0 %v2414_v21  ;;  %2282 = vmatpush3.bf16.msra.mxu1 %v2415_v22 }
 0x16a   :  { %1160 = vmatprep.subr.bf16.mxu0 %v2418_v31  ;;  %1201 = vmatprep.subr.bf16.mxu1 %v2421_v33 }
 0x1ce   :  { %v1017_v20 = vpop.permute.xlu0 %1016 }
 0x21f   :  { %v506_v40 = vpop.f32.mrb[4].mxu0  ;;  %v588_v41 = vpop.f32.mrb[4].mxu1 }
 0x220   :  { %v616_v51 = vmul.f32 %v599_v35, %v506_v40  ;;  %v618_v44 = vmul.f32 %v607_v36, %v588_v41  ;;  %v508_v45 = vpop.f32.mrb[5].mxu0  ;;  %v590_v46 = vpop.f32.mrb[5].mxu1  ;;  %v2427_v35 = vld [vmem:[#allocation2 + $0x2c] ss:$16 sps:$4 sm:$0xff]   ;;  %v2422_v36 = vld [vmem:[#allocation2 + $0x20] ss:$16 sps:$4 sm:$0xff]  }
 0x221   :  { %v617_v47 = vmul.f32 %v603_v37, %v508_v45  ;;  %v619_v48 = vmul.f32 %v611_v49, %v590_v46  ;;  %v510_v53 = vpop.f32.mrb[6].mxu0  ;;  %v592_v3 = vpop.f32.mrb[6].mxu1  ;;  %v2425_v37 = vld [vmem:[#allocation2 + $0x28] ss:$16 sps:$4 sm:$0xff]   ;;  %v2430_v49 = vld [vmem:[#allocation2 + $0x44] ss:$16 sps:$4 sm:$0xff]  }
 0x222   :  { %v641_v55 = vadd.f32 %v624_v38, %v616_v51  ;;  %v643_v56 = vadd.f32 %v632_v39, %v618_v44  ;;  %v511_v57 = vpop.f32.mrb[7].mxu0  ;;  %v593_v58 = vpop.f32.mrb[7].mxu1  ;;  %v2433_v38 = vld [vmem:[#allocation2 + $0x4c] ss:$16 sps:$4 sm:$0xff]   ;;  %v2428_v39 = vld [vmem:[#allocation2 + $0x40] ss:$16 sps:$4 sm:$0xff]  }
 0x223   :  { %v642_v59 = vadd.f32 %v628_v42, %v617_v47  ;;  %v644_v60 = vadd.f32 %v636_v43, %v619_v48  ;;  %v2431_v40 = vld [vmem:[#allocation2 + $0x48] ss:$16 sps:$4 sm:$0xff]   ;;  %v2436_v41 = vld [vmem:[#allocation2 + $0x64] ss:$16 sps:$4 sm:$0xff]   ;;  %v2439_v42 = vld [vmem:[#allocation2 + $0x6c] ss:$16 sps:$4 sm:$0xff]  }
 0x224   :  { %v645_v61 = vmax.f32 %v641_v55, 0.0  ;;  %v647_v62 = vmax.f32 %v643_v56, 0.0  ;;  %v2434_v51 = vld [vmem:[#allocation2 + $0x60] ss:$16 sps:$4 sm:$0xff]   ;;  %v2437_v44 = vld [vmem:[#allocation2 + $0x68] ss:$16 sps:$4 sm:$0xff]  }
 0x225   :  { %v646_v63 = vmax.f32 %v642_v59, 0.0  ;;  %v648_v1 = vmax.f32 %v644_v60, 0.0  ;;  %v1247_v48 = vld [vmem:[#allocation4 + $0x8] sm:$0xff]  ;;  %v1249_v53 = vld [vmem:[#allocation4 + $0x18] sm:$0xff]  ;;  %v1246_v56 = vld [vmem:[#allocation4] sm:$0xff] }
 0x226   :  { %v649_v5 = vpack.c.bf16 %v645_v61, %v645_v61  ;;  %v651_v6 = vpack.c.bf16 %v647_v62, %v647_v62  ;;  %v1311_v3 = vunpack.c.l.s8.bf16 %v1247_v48  ;;  %v1313_v55 = vunpack.c.l.s8.bf16 %v1249_v53  ;;  %v1248_v57 = vld [vmem:[#allocation4 + $0x10] sm:$0xff] }
 0x227   :  { %v650_v2 = vpack.c.bf16 %v646_v63, %v646_v63  ;;  %v652_v4 = vpack.c.bf16 %v648_v1, %v648_v1  ;;  %v1310_v61 = vunpack.c.l.s8.bf16 %v1246_v56  ;;  %v1312_v62 = vunpack.c.l.s8.bf16 %v1248_v57 }
 0x228   :  { %v1315_v1 = vunpack.c.h.s8.bf16 %v1247_v48  ;;  %v1316_v7 = vunpack.c.h.s8.bf16 %v1248_v57  ;;  %v1269_v57 = vld [vmem:[#allocation4 + $0xb8] sm:$0xff] }
 0x229   :  { %947 = vmatprep.mubr.bf16.mxu0 %v650_v2  ;;  %987 = vmatprep.mubr.bf16.mxu1 %v652_v4  ;;  %v1317_v2 = vunpack.c.h.s8.bf16 %v1249_v53  ;;  %v1251_v4 = vld [vmem:[#allocation4 + $0x28] sm:$0xff] }
 0x22a   :  { %948 = vmatmul.mubr.bf16.vlgmr.msra.gmra.mrb[8].mxu0 %v649_v5  ;;  %988 = vmatmul.mubr.bf16.vlgmr.msra.gmra.mrb[8].mxu1 %v651_v6  ;;  %v1253_v5 = vld [vmem:[#allocation4 + $0x38] sm:$0xff]  ;;  %v1314_v6 = vunpack.c.h.s8.bf16 %v1246_v56  ;;  %v1267_v56 = vld [vmem:[#allocation4 + $0xa8] sm:$0xff] }
 0x22b   :  { %1192 = vmatprep.mubr.bf16.mxu0 %v2550_v0  ;;  %1233 = vmatprep.mubr.bf16.mxu1 %v2550_v0 }
 0x22c   :  { %1161 = vmatpush1.bf16.msra.mxu0 %v2416_v29  ;;  %1202 = vmatpush1.bf16.msra.mxu1 %v2419_v32  ;;  %v1261_v29 = vld [vmem:[#allocation4 + $0x78] sm:$0xff] }
 0x22d   :  { %1162 = vmatprep.subr.bf16.mxu0 %v2424_v34  ;;  %1203 = vmatprep.subr.bf16.mxu1 %v2427_v35  ;;  %v1337_v34 = vunpack.c.l.s8.bf16 %v1261_v29  ;;  %v1258_v35 = vld [vmem:[#allocation4 + $0x60] sm:$0xff] }
 0x230   :  { %1163 = vmatpush1.bf16.msra.mxu0 %v2422_v36  ;;  %1204 = vmatpush1.bf16.msra.mxu1 %v2425_v37  ;;  %v1260_v36 = vld [vmem:[#allocation4 + $0x70] sm:$0xff]  ;;  %v1334_v37 = vunpack.c.l.s8.bf16 %v1258_v35 }
 0x231   :  { %1164 = vmatprep.subr.bf16.mxu0 %v2430_v49  ;;  %1205 = vmatprep.subr.bf16.mxu1 %v2433_v38  ;;  %v1336_v49 = vunpack.c.l.s8.bf16 %v1260_v36 }
 0x234   :  { %1165 = vmatpush1.bf16.msra.mxu0 %v2428_v39  ;;  %1206 = vmatpush1.bf16.msra.mxu1 %v2431_v40  ;;  %v1341_v39 = vunpack.c.h.s8.bf16 %v1261_v29  ;;  %v1263_v40 = vld [vmem:[#allocation4 + $0x88] sm:$0xff] }
 0x235   :  { %1166 = vmatprep.subr.bf16.mxu0 %v2436_v41  ;;  %1207 = vmatprep.subr.bf16.mxu1 %v2439_v42  ;;  %v1265_v41 = vld [vmem:[#allocation4 + $0x98] sm:$0xff]  ;;  %v1338_v42 = vunpack.c.h.s8.bf16 %v1258_v35 }
 0x238   :  { %1167 = vmatpush1.bf16.msra.mxu0 %v2434_v51  ;;  %1208 = vmatpush1.bf16.msra.mxu1 %v2437_v44  ;;  %v1343_v51 = vunpack.c.l.s8.bf16 %v1263_v40  ;;  %v1345_v44 = vunpack.c.l.s8.bf16 %v1265_v41 }
 0x239   :  { %1442 = vmatprep.subr.bf16.mxu0 %v1311_v3  ;;  %1524 = vmatprep.subr.bf16.mxu1 %v1313_v55  ;;  %v1347_v3 = vunpack.c.h.s8.bf16 %v1263_v40  ;;  %v1349_v55 = vunpack.c.h.s8.bf16 %v1265_v41 }
 0x2fd   :  { %v2261_v8 = vpop.f32.mrb[8].mxu0  ;;  %v2283_v9 = vpop.f32.mrb[8].mxu1 }
 0x2fe   :  { %v2262_v11 = vpop.f32.mrb[9].mxu0  ;;  %v2284_v12 = vpop.f32.mrb[9].mxu1 }
 0x2ff   :  { %v2263_v13 = vadd.f32 %v2262_v11, %v2261_v8  ;;  %v2285_v14 = vadd.f32 %v2284_v12, %v2283_v9  ;;  %v2264_v15 = vpop.f32.mrb[10].mxu0  ;;  %v2286_v16 = vpop.f32.mrb[10].mxu1  ;;  %v1321_v8 = vunpack.c.l.s8.bf16 %v1253_v5  ;;  %v1250_v9 = vld [vmem:[#allocation4 + $0x20] sm:$0xff] }
 0x300   :  { %v2265_v17 = vpop.f32.mrb[11].mxu0  ;;  %v2287_v18 = vpop.f32.mrb[11].mxu1  ;;  %v1318_v11 = vunpack.c.l.s8.bf16 %v1250_v9  ;;  %v1255_v15 = vld [vmem:[#allocation4 + $0x48] sm:$0xff]  ;;  %v1257_v16 = vld [vmem:[#allocation4 + $0x58] sm:$0xff] }
 0x301   :  { %v950_v19 = vadd.f32 %v2263_v13, %v721_v10  ;;  %v1323_v13 = vunpack.c.h.s8.bf16 %v1251_v4  ;;  %v1322_v17 = vunpack.c.h.s8.bf16 %v1250_v9 }
 0x303   :  { %v3010_v21 = vadd.f32 %v2285_v14, %v950_v19  ;;  %v1325_v14 = vunpack.c.h.s8.bf16 %v1253_v5  ;;  %v1327_v19 = vunpack.c.l.s8.bf16 %v1255_v15  ;;  %v1357_v5 = vunpack.c.h.s8.bf16 %v1269_v57 }
 0x305   :  { %v1019_v0 = vadd.f32 %v1017_v20, %v3010_v21  ;;  %v996_v47 = vsel %vm995_vm1, %v3010_v21, -inf  ;;  %v1329_v20 = vunpack.c.l.s8.bf16 %v1257_v16 }
 0x307   :  { %v1020_v22 = vsel %vm995_vm1, %v1019_v0, -inf }
 0x308   :  { %1021 = vmax.xlane.f32.xlu0 %v1020_v22  ;;  %v1256_v22 = vld [vmem:[#allocation4 + $0x50] sm:$0xff] }
 0x309   :  { %v1332_v32 = vunpack.c.h.s8.bf16 %v1256_v22 }
 0x31e   :  { %2038 = vrot.lane.b32.xlu0 %v721_v10, %s2552_s4 }
 0x395   :  { %v1022_v24 = vpop.xlane.xlu0 %1021 }
 0x396   :  { %v1023_v25 = vsub.f32 %v1019_v0, %v1022_v24  ;;  %v1254_v0 = vld [vmem:[#allocation4 + $0x40] sm:$0xff] }
 0x397   :  { %v1326_v24 = vunpack.c.l.s8.bf16 %v1254_v0  ;;  %v1330_v31 = vunpack.c.h.s8.bf16 %v1254_v0 }
 0x398   :  { %v1024_v26 = vmul.f32 1.442695, %v1023_v25  ;;  %v1328_v25 = vunpack.c.l.s8.bf16 %v1256_v22 }
 0x39a   :  { %2476 = vpow2.f32 %v1024_v26  ;;  %v1331_v26 = vunpack.c.h.s8.bf16 %v1255_v15 }
 0x3a4   :  { %v2477_v27 = vpop.eup %2476 }
 0x3a5   :  { %v1026_v28 = vsel %vm995_vm1, %v2477_v27, 0.0 }
 0x3a6   :  { %1027 = vadd.xlane.f32.xlu1 %v1026_v28  ;;  %v1259_v28 = vld [vmem:[#allocation4 + $0x68] sm:$0xff] }
 0x3a7   :  { %v1335_v33 = vunpack.c.l.s8.bf16 %v1259_v28  ;;  %v1339_v38 = vunpack.c.h.s8.bf16 %v1259_v28 }
 0x433   :  { %v1028_v43 = vpop.xlane.xlu1 %1027 }
 0x434   :  { %2478 = vrcp.f32 %v1028_v43  ;;  %v1340_v43 = vunpack.c.h.s8.bf16 %v1260_v36 }
 0x43e   :  { %v2479_v45 = vpop.eup %2478 }
 0x43f   :  { %v3016_v46 = vmul.f32 %v2479_v45, %v2477_v27  ;;  %v1333_v27 = vunpack.c.h.s8.bf16 %v1257_v16  ;;  %v1262_v45 = vld [vmem:[#allocation4 + $0x80] sm:$0xff] }
 0x440   :  { %v1342_v48 = vunpack.c.l.s8.bf16 %v1262_v45 }
 0x441   :  { %1032 = vrot.lane.b32.xlu1 %v3016_v46, %s2549_s10 }
 0x445   :  { %1920 = vrot.lane.b32.xlu1 %v721_v10, %s2553_s13  ;;  %v1252_v10 = vld [vmem:[#allocation4 + $0x30] sm:$0xff] }
 0x446   :  { %v1320_v12 = vunpack.c.l.s8.bf16 %v1252_v10  ;;  %v1324_v18 = vunpack.c.h.s8.bf16 %v1252_v10 }
 0x469   :  { %997 = vmax.xlane.f32.xlu1 %v996_v47  ;;  %v1264_v47 = vld [vmem:[#allocation4 + $0x90] sm:$0xff] }
 0x46a   :  { %v1344_v53 = vunpack.c.l.s8.bf16 %v1264_v47 }
 0x4b3   :  { %v1033_v58 = vpop.permute.xlu1 %1032 }
 0x4b4   :  { %v1035_v59 = vsel %vm145_vm0, %v2987_v23, %v1033_v58  ;;  %v1319_v23 = vunpack.c.l.s8.bf16 %v1251_v4  ;;  %v1346_v58 = vunpack.c.h.s8.bf16 %v1262_v45  ;;  %v1355_v4 = vunpack.c.h.s8.bf16 %v1267_v56 }
 0x4b5   :  { %v1037_v60 = vsel %vm1036_vm2, %v1035_v59, 0.0  ;;  %v1348_v59 = vunpack.c.h.s8.bf16 %v1264_v47 }
 0x4b6   :  { %v1038_v63 = vpack.c.bf16 %v1037_v60, %v1037_v60  ;;  %v1351_v60 = vunpack.c.l.s8.bf16 %v1267_v56 }
 0x4b8   :  { %2210 = vmatmul.mubr.msk.bf16.vlgmr.msra.gmra.mrb[12].mxu0 %vm1156_vm3, %v1038_v63  ;;  %2211 = vmatmul.mubr.msk.bf16.vlgmr.msra.gmra.mrb[12].mxu1 %vm1156_vm3, %v1038_v63  ;;  %v1268_v63 = vld [vmem:[#allocation4 + $0xb0] sm:$0xff] }
 0x4b9   :  { %1443 = vmatpush1.bf16.msra.mxu0 %v1310_v61  ;;  %1525 = vmatpush1.bf16.msra.mxu1 %v1312_v62  ;;  %v1353_v61 = vunpack.c.l.s8.bf16 %v1269_v57  ;;  %v1266_v62 = vld [vmem:[#allocation4 + $0xa0] sm:$0xff] }
 0x4ba   :  { %1444 = vmatprep.subr.bf16.mxu0 %v1315_v1  ;;  %1526 = vmatprep.subr.bf16.mxu1 %v1317_v2  ;;  %v1350_v1 = vunpack.c.l.s8.bf16 %v1266_v62  ;;  %v1352_v2 = vunpack.c.l.s8.bf16 %v1268_v63 }
 0x4bd   :  { %1445 = vmatpush1.bf16.msra.mxu0 %v1314_v6  ;;  %1527 = vmatpush1.bf16.msra.mxu1 %v1316_v7  ;;  %v1271_v6 = vld [vmem:[#allocation4 + $0xc8] sm:$0xff]  ;;  %v1273_v7 = vld [vmem:[#allocation4 + $0xd8] sm:$0xff] }
 0x4be   :  { %1446 = vmatprep.subr.bf16.mxu0 %v1319_v23  ;;  %1528 = vmatprep.subr.bf16.mxu1 %v1321_v8  ;;  %v1354_v23 = vunpack.c.h.s8.bf16 %v1266_v62  ;;  %v1356_v8 = vunpack.c.h.s8.bf16 %v1268_v63  ;;  %v1359_v9 = vunpack.c.l.s8.bf16 %v1271_v6  ;;  %v1361_v10 = vunpack.c.l.s8.bf16 %v1273_v7  ;;  %v1278_v62 = vld [vmem:[#allocation4 + $0x100] sm:$0xff]  ;;  %v1280_v63 = vld [vmem:[#allocation4 + $0x110] sm:$0xff] }
 0x4bf   :  { %v1363_v15 = vunpack.c.h.s8.bf16 %v1271_v6  ;;  %v1365_v16 = vunpack.c.h.s8.bf16 %v1273_v7  ;;  %v1376_v6 = vunpack.c.l.s8.bf16 %v1280_v63 }
 0x4c1   :  { %1447 = vmatpush1.bf16.msra.mxu0 %v1318_v11  ;;  %1529 = vmatpush1.bf16.msra.mxu1 %v1320_v12  ;;  %v1270_v11 = vld [vmem:[#allocation4 + $0xc0] sm:$0xff]  ;;  %v1272_v12 = vld [vmem:[#allocation4 + $0xd0] sm:$0xff] }
 0x4c2   :  { %1448 = vmatprep.subr.bf16.mxu0 %v1323_v13  ;;  %1530 = vmatprep.subr.bf16.mxu1 %v1325_v14  ;;  %v1358_v13 = vunpack.c.l.s8.bf16 %v1270_v11  ;;  %v1360_v14 = vunpack.c.l.s8.bf16 %v1272_v12 }
 0x4c5   :  { %1449 = vmatpush1.bf16.msra.mxu0 %v1322_v17  ;;  %1531 = vmatpush1.bf16.msra.mxu1 %v1324_v18  ;;  %v1362_v17 = vunpack.c.h.s8.bf16 %v1270_v11  ;;  %v1364_v18 = vunpack.c.h.s8.bf16 %v1272_v12  ;;  %v1378_v12 = vunpack.c.h.s8.bf16 %v1278_v62 }
 0x4c6   :  { %1450 = vmatprep.subr.bf16.mxu0 %v1327_v19  ;;  %1532 = vmatprep.subr.bf16.mxu1 %v1329_v20  ;;  %v3026_v19 = vpop.permute.xlu1 %1920 }
 0x4c9   :  { %1451 = vmatpush1.bf16.msra.mxu0 %v1326_v24  ;;  %1533 = vmatpush1.bf16.msra.mxu1 %v1328_v25 }
 0x4ca   :  { %1452 = vmatprep.subr.bf16.mxu0 %v1331_v26  ;;  %1534 = vmatprep.subr.bf16.mxu1 %v1333_v27  ;;  %v1275_v26 = vld [vmem:[#allocation4 + $0xe8] sm:$0xff]  ;;  %v1277_v27 = vld [vmem:[#allocation4 + $0xf8] sm:$0xff] }
 0x4cb   :  { %v1367_v28 = vunpack.c.l.s8.bf16 %v1275_v26  ;;  %v1369_v29 = vunpack.c.l.s8.bf16 %v1277_v27  ;;  %v1371_v35 = vunpack.c.h.s8.bf16 %v1275_v26  ;;  %v1373_v36 = vunpack.c.h.s8.bf16 %v1277_v27  ;;  %v1289_v26 = vld [vmem:[#allocation4 + $0x158] sm:$0xff] }
 0x4cd   :  { %1453 = vmatpush1.bf16.msra.mxu0 %v1330_v31  ;;  %1535 = vmatpush1.bf16.msra.mxu1 %v1332_v32  ;;  %v1274_v31 = vld [vmem:[#allocation4 + $0xe0] sm:$0xff]  ;;  %v1276_v32 = vld [vmem:[#allocation4 + $0xf0] sm:$0xff] }
 0x4ce   :  { %1454 = vmatprep.subr.bf16.mxu0 %v1335_v33  ;;  %1536 = vmatprep.subr.bf16.mxu1 %v1337_v34  ;;  %v1366_v33 = vunpack.c.l.s8.bf16 %v1274_v31  ;;  %v1368_v34 = vunpack.c.l.s8.bf16 %v1276_v32 }
 0x4d1   :  { %1455 = vmatpush1.bf16.msra.mxu0 %v1334_v37  ;;  %1537 = vmatpush1.bf16.msra.mxu1 %v1336_v49  ;;  %v1370_v37 = vunpack.c.h.s8.bf16 %v1274_v31  ;;  %v1372_v49 = vunpack.c.h.s8.bf16 %v1276_v32  ;;  %v1393_v31 = vunpack.c.l.s8.bf16 %v1289_v26  ;;  %v1286_v32 = vld [vmem:[#allocation4 + $0x140] sm:$0xff] }
 0x4d2   :  { %1456 = vmatprep.subr.bf16.mxu0 %v1339_v38  ;;  %1538 = vmatprep.subr.bf16.mxu1 %v1341_v39  ;;  %v1279_v38 = vld [vmem:[#allocation4 + $0x108] sm:$0xff]  ;;  %v1281_v39 = vld [vmem:[#allocation4 + $0x118] sm:$0xff] }
 0x4d3   :  { %v1375_v40 = vunpack.c.l.s8.bf16 %v1279_v38  ;;  %v1377_v41 = vunpack.c.l.s8.bf16 %v1281_v39 }
 0x4d5   :  { %1457 = vmatpush1.bf16.msra.mxu0 %v1338_v42  ;;  %1539 = vmatpush1.bf16.msra.mxu1 %v1340_v43  ;;  %v3036_v42 = vld [vmem:[%s3196_s8 + $0x2] ss:$8 sm:$0xf] }
 0x4d6   :  { %1458 = vmatprep.subr.bf16.mxu0 %v1343_v51  ;;  %1540 = vmatprep.subr.bf16.mxu1 %v1345_v44  ;;  %v1059_v43 = vrot.slane %v3036_v42, %v2771_v50  ;;  %v1063_v51 = vrot.slane %v3036_v42, %v2779_v52  ;;  %v1071_v44 = vrot.slane %v3036_v42, %v2784_v54 }
 0x4d9   :  { %1459 = vmatpush1.bf16.msra.mxu0 %v1342_v48  ;;  %1541 = vmatpush1.bf16.msra.mxu1 %v1344_v53 }
 0x4da   :  { %1460 = vmatprep.subr.bf16.mxu0 %v1347_v3  ;;  %1542 = vmatprep.subr.bf16.mxu1 %v1349_v55 }
 0x4dd   :  { %1461 = vmatpush1.bf16.msra.mxu0 %v1346_v58  ;;  %1543 = vmatpush1.bf16.msra.mxu1 %v1348_v59 }
 0x4de   :  { %1462 = vmatprep.subr.bf16.mxu0 %v1351_v60  ;;  %1544 = vmatprep.subr.bf16.mxu1 %v1353_v61 }
 0x4e1   :  { %1463 = vmatpush1.bf16.msra.mxu0 %v1350_v1  ;;  %1545 = vmatpush1.bf16.msra.mxu1 %v1352_v2 }
 0x4e2   :  { %1464 = vmatprep.subr.bf16.mxu0 %v1355_v4  ;;  %1546 = vmatprep.subr.bf16.mxu1 %v1357_v5  ;;  %v1374_v5 = vunpack.c.l.s8.bf16 %v1278_v62  ;;  %v1296_v62 = vld [vmem:[#allocation4 + $0x190] sm:$0xff] }
 0x4e5   :  { %1465 = vmatpush1.bf16.msra.mxu0 %v1354_v23  ;;  %1547 = vmatpush1.bf16.msra.mxu1 %v1356_v8  ;;  %v1379_v23 = vunpack.c.h.s8.bf16 %v1279_v38  ;;  %v1381_v8 = vunpack.c.h.s8.bf16 %v1281_v39  ;;  %v1293_v38 = vld [vmem:[#allocation4 + $0x178] sm:$0xff]  ;;  %v1394_v39 = vunpack.c.h.s8.bf16 %v1286_v32 }
 0x4e6   :  { %1466 = vmatprep.subr.bf16.mxu0 %v1359_v9  ;;  %1548 = vmatprep.subr.bf16.mxu1 %v1361_v10  ;;  %v1283_v9 = vld [vmem:[#allocation4 + $0x128] sm:$0xff]  ;;  %v1285_v10 = vld [vmem:[#allocation4 + $0x138] sm:$0xff] }
 0x4e9   :  { %1467 = vmatpush1.bf16.msra.mxu0 %v1358_v13  ;;  %1549 = vmatpush1.bf16.msra.mxu1 %v1360_v14  ;;  %v1380_v13 = vunpack.c.h.s8.bf16 %v1280_v63  ;;  %v1383_v14 = vunpack.c.l.s8.bf16 %v1283_v9 }
 0x4ea   :  { %1468 = vmatprep.subr.bf16.mxu0 %v1363_v15  ;;  %1550 = vmatprep.subr.bf16.mxu1 %v1365_v16  ;;  %v1385_v15 = vunpack.c.l.s8.bf16 %v1285_v10  ;;  %v1282_v16 = vld [vmem:[#allocation4 + $0x120] sm:$0xff] }
 0x4eb   :  { %v1386_v27 = vunpack.c.h.s8.bf16 %v1282_v16 }
 0x4ed   :  { %1469 = vmatpush1.bf16.msra.mxu0 %v1362_v17  ;;  %1551 = vmatpush1.bf16.msra.mxu1 %v1364_v18  ;;  %v1284_v17 = vld [vmem:[#allocation4 + $0x130] sm:$0xff]  ;;  %v1382_v18 = vunpack.c.l.s8.bf16 %v1282_v16  ;;  %v1303_v16 = vld [vmem:[#allocation4 + $0x1c8] sm:$0xff] }
 0x4ee   :  { %1470 = vmatprep.subr.bf16.mxu0 %v1367_v28  ;;  %1552 = vmatprep.subr.bf16.mxu1 %v1369_v29  ;;  %v1388_v28 = vunpack.c.h.s8.bf16 %v1284_v17 }
 0x4f1   :  { %1471 = vmatpush1.bf16.msra.mxu0 %v1366_v33  ;;  %1553 = vmatpush1.bf16.msra.mxu1 %v1368_v34  ;;  %v1288_v33 = vld [vmem:[#allocation4 + $0x150] sm:$0xff]  ;;  %v1390_v34 = vunpack.c.l.s8.bf16 %v1286_v32  ;;  %v1307_v32 = vld [vmem:[#allocation4 + $0x1e8] sm:$0xff] }
 0x4f2   :  { %1472 = vmatprep.subr.bf16.mxu0 %v1371_v35  ;;  %1554 = vmatprep.subr.bf16.mxu1 %v1373_v36  ;;  %v1392_v35 = vunpack.c.l.s8.bf16 %v1288_v33 }
 0x4f5   :  { %1473 = vmatpush1.bf16.msra.mxu0 %v1370_v37  ;;  %1555 = vmatpush1.bf16.msra.mxu1 %v1372_v49  ;;  %v1397_v37 = vunpack.c.h.s8.bf16 %v1289_v26  ;;  %v1291_v49 = vld [vmem:[#allocation4 + $0x168] sm:$0xff]  ;;  %v1304_v26 = vld [vmem:[#allocation4 + $0x1d0] sm:$0xff] }
 0x4f6   :  { %v998_v20 = vpop.xlane.xlu1 %997  ;;  %1483 = vmatprep.subr.bf16.mxu0 %v1375_v40  ;;  %1565 = vmatprep.subr.bf16.mxu1 %v1377_v41  ;;  %v1396_v40 = vunpack.c.h.s8.bf16 %v1288_v33  ;;  %v1399_v41 = vunpack.c.l.s8.bf16 %v1291_v49  ;;  %v1309_v33 = vld [vmem:[#allocation4 + $0x1f8] sm:$0xff] }
 0x4f7   :  { %v999_v0 = vsub.f32 %v3010_v21, %v998_v20  ;;  %v1384_v20 = vunpack.c.l.s8.bf16 %v1284_v17  ;;  %v1305_v17 = vld [vmem:[#allocation4 + $0x1d8] sm:$0xff] }
 0x4f9   :  { %v1000_v22 = vmul.f32 1.442695, %v999_v0  ;;  %v1387_v0 = vunpack.c.h.s8.bf16 %v1283_v9 }
 0x4fb   :  { %2480 = vpow2.f32 %v1000_v22  ;;  %v1389_v22 = vunpack.c.h.s8.bf16 %v1285_v10  ;;  %v1298_v10 = vld [vmem:[#allocation4 + $0x1a0] sm:$0xff] }
 0x505   :  { %v3029_v24 = vpop.eup %2480 }
 0x506   :  { %v1002_v25 = vsel %vm995_vm1, %v3029_v24, 0.0 }
 0x507   :  { %1003 = vadd.xlane.f32.xlu0 %v1002_v25  ;;  %v1287_v25 = vld [vmem:[#allocation4 + $0x148] sm:$0xff] }
 0x508   :  { %v1391_v29 = vunpack.c.l.s8.bf16 %v1287_v25  ;;  %v1395_v36 = vunpack.c.h.s8.bf16 %v1287_v25  ;;  %v1302_v25 = vld [vmem:[#allocation4 + $0x1c0] sm:$0xff] }
 0x58b   :  { %v1194_v45 = vpop.f32.mrb[12].mxu0  ;;  %v3044_v47 = vpop.f32.mrb[12].mxu1 }
 0x58c   :  { %v1195_v48 = vadd.f32 %v1194_v45, %v1059_v43  ;;  %v1196_v53 = vpop.f32.mrb[13].mxu0  ;;  %v1237_v3 = vpop.f32.mrb[13].mxu1  ;;  %v1401_v43 = vunpack.c.l.s8.bf16 %v1293_v38 }
 0x58d   :  { %v1197_v55 = vadd.f32 %v1196_v53, %v1063_v51  ;;  %v1238_v56 = vadd.f32 %v1237_v3, %v1071_v44  ;;  %v1198_v57 = vpop.f32.mrb[14].mxu0  ;;  %v1239_v58 = vpop.f32.mrb[14].mxu1  ;;  %v1290_v51 = vld [vmem:[#allocation4 + $0x160] sm:$0xff]  ;;  %v1292_v44 = vld [vmem:[#allocation4 + $0x170] sm:$0xff]  ;;  %v1403_v53 = vunpack.c.h.s8.bf16 %v1291_v49  ;;  %v1405_v3 = vunpack.c.h.s8.bf16 %v1293_v38 }
 0x58e   :  { %v1242_v59 = vmax.f32 %v1195_v48, 0.0  ;;  %v1199_v60 = vpop.f32.mrb[15].mxu0  ;;  %v1240_v61 = vpop.f32.mrb[15].mxu1  ;;  %v1398_v45 = vunpack.c.l.s8.bf16 %v1290_v51  ;;  %v1400_v48 = vunpack.c.l.s8.bf16 %v1292_v44  ;;  %v1402_v57 = vunpack.c.h.s8.bf16 %v1290_v51  ;;  %v1306_v38 = vld [vmem:[#allocation4 + $0x1e0] sm:$0xff] }
 0x58f   :  { %v1243_v1 = vmax.f32 %v1197_v55, 0.0  ;;  %v1245_v2 = vmax.f32 %v1238_v56, 0.0  ;;  %v1295_v55 = vld [vmem:[#allocation4 + $0x188] sm:$0xff]  ;;  %v1297_v56 = vld [vmem:[#allocation4 + $0x198] sm:$0xff]  ;;  %v1404_v58 = vunpack.c.h.s8.bf16 %v1292_v44  ;;  %v1294_v61 = vld [vmem:[#allocation4 + $0x180] sm:$0xff]  ;;  %v1433_v49 = vunpack.c.l.s8.bf16 %v1309_v33 }
 0x590   :  { %v1438_v7 = vpack.c.bf16 %v1242_v59, %v1242_v59  ;;  %v1407_v59 = vunpack.c.l.s8.bf16 %v1295_v55  ;;  %v1409_v60 = vunpack.c.l.s8.bf16 %v1297_v56  ;;  %v1406_v63 = vunpack.c.l.s8.bf16 %v1294_v61 }
 0x591   :  { %v1439_v4 = vpack.c.bf16 %v1243_v1, %v1243_v1  ;;  %v1441_v11 = vpack.c.bf16 %v1245_v2, %v1245_v2  ;;  %v1408_v1 = vunpack.c.l.s8.bf16 %v1296_v62  ;;  %v1411_v2 = vunpack.c.h.s8.bf16 %v1295_v55  ;;  %v2443_v55 = vld [vmem:[%s3194_s6 + $0x80] sm:$0xff]  }
 0x592   :  { %v1435_v51 = vunpack.c.h.s8.bf16 %v1307_v32  ;;  %v1437_v44 = vunpack.c.h.s8.bf16 %v1309_v33 }
 0x593   :  { %1474 = vmatprep.mubr.bf16.mxu0 %v1439_v4  ;;  %1556 = vmatprep.mubr.bf16.mxu1 %v1439_v4  ;;  %v1413_v4 = vunpack.c.h.s8.bf16 %v1297_v56 }
 0x594   :  { %1475 = vmatmul.mubr.bf16.vlgmr.msra.gmra.mrb[16].mxu0 %v1438_v7  ;;  %1557 = vmatmul.mubr.bf16.vlgmr.msra.gmra.mrb[16].mxu1 %v1438_v7  ;;  %v1410_v7 = vunpack.c.h.s8.bf16 %v1294_v61  ;;  %v2448_v61 = vld [vmem:[%s3194_s6 + $0x50] sm:$0xff]  }
 0x595   :  { %1484 = vmatpush1.bf16.msra.mxu0 %v1374_v5  ;;  %1566 = vmatpush1.bf16.msra.mxu1 %v1376_v6  ;;  %v1299_v5 = vld [vmem:[#allocation4 + $0x1a8] sm:$0xff]  ;;  %v1301_v6 = vld [vmem:[#allocation4 + $0x1b8] sm:$0xff] }
 0x596   :  { %1515 = vmatprep.mubr.bf16.mxu0 %v1441_v11  ;;  %1597 = vmatprep.mubr.bf16.mxu1 %v1441_v11  ;;  %v1417_v9 = vunpack.c.l.s8.bf16 %v1301_v6  ;;  %v1300_v11 = vld [vmem:[#allocation4 + $0x1b0] sm:$0xff] }
 0x597   :  { %1485 = vmatprep.subr.bf16.mxu0 %v1379_v23  ;;  %1567 = vmatprep.subr.bf16.mxu1 %v1381_v8  ;;  %v1412_v23 = vunpack.c.h.s8.bf16 %v1296_v62  ;;  %v1415_v8 = vunpack.c.l.s8.bf16 %v1299_v5  ;;  %v2449_v62 = vld [vmem:[%s3194_s6 + $0xd0] sm:$0xff]  }
 0x599   :  { %1486 = vmatpush1.bf16.msra.mxu0 %v1378_v12  ;;  %1568 = vmatpush1.bf16.msra.mxu1 %v1380_v13  ;;  %v1414_v12 = vunpack.c.l.s8.bf16 %v1298_v10  ;;  %v1416_v13 = vunpack.c.l.s8.bf16 %v1300_v11 }
 0x59a   :  { %1487 = vmatprep.subr.bf16.mxu0 %v1383_v14  ;;  %1569 = vmatprep.subr.bf16.mxu1 %v1385_v15  ;;  %v1419_v14 = vunpack.c.h.s8.bf16 %v1299_v5  ;;  %v1421_v15 = vunpack.c.h.s8.bf16 %v1301_v6  ;;  %v2454_v5 = vld [vmem:[%s3194_s6 + $0x18] sm:$0xff]  }
 0x59b   :  { %v2455_v6 = vld [vmem:[%s3194_s6 + $0x98] sm:$0xff]  }
 0x59d   :  { %1488 = vmatpush1.bf16.msra.mxu0 %v1382_v18  ;;  %1570 = vmatpush1.bf16.msra.mxu1 %v1384_v20  ;;  %v1418_v18 = vunpack.c.h.s8.bf16 %v1298_v10  ;;  %v1420_v20 = vunpack.c.h.s8.bf16 %v1300_v11  ;;  %v2460_v10 = vld [vmem:[%s3194_s6 + $0x68] sm:$0xff]  }
 0x59e   :  { %1489 = vmatprep.subr.bf16.mxu0 %v1387_v0  ;;  %1571 = vmatprep.subr.bf16.mxu1 %v1389_v22  ;;  %v1423_v0 = vunpack.c.l.s8.bf16 %v1303_v16  ;;  %v1425_v22 = vunpack.c.l.s8.bf16 %v1305_v17  ;;  %v2461_v11 = vld [vmem:[%s3194_s6 + $0xe8] sm:$0xff]  }
 0x5a1   :  { %1490 = vmatpush1.bf16.msra.mxu0 %v1386_v27  ;;  %1572 = vmatpush1.bf16.msra.mxu1 %v1388_v28  ;;  %v1422_v27 = vunpack.c.l.s8.bf16 %v1302_v25  ;;  %v1424_v28 = vunpack.c.l.s8.bf16 %v1304_v26 }
 0x5a2   :  { %1491 = vmatprep.subr.bf16.mxu0 %v1391_v29  ;;  %1573 = vmatprep.subr.bf16.mxu1 %v1393_v31  ;;  %v1427_v29 = vunpack.c.h.s8.bf16 %v1303_v16  ;;  %v1429_v31 = vunpack.c.h.s8.bf16 %v1305_v17  ;;  %v2466_v16 = vld [vmem:[%s3194_s6 + $0x30] sm:$0xff]  }
 0x5a3   :  { %v2467_v17 = vld [vmem:[%s3194_s6 + $0xb0] sm:$0xff]  }
 0x5a5   :  { %1492 = vmatpush1.bf16.msra.mxu0 %v1390_v34  ;;  %1574 = vmatpush1.bf16.msra.mxu1 %v1392_v35  ;;  %v1426_v34 = vunpack.c.h.s8.bf16 %v1302_v25  ;;  %v1428_v35 = vunpack.c.h.s8.bf16 %v1304_v26  ;;  %v2554_v25 = vmov 0.0   ;;  %v2151_v26 = vld [vmem:[%s3196_s8 + $0x6] ss:$8 sm:$0xf] }
 0x5a6   :  { %1493 = vmatprep.subr.bf16.mxu0 %v1395_v36  ;;  %1575 = vmatprep.subr.bf16.mxu1 %v1397_v37  ;;  %v1067_v36 = vrot.slane %v3036_v42, %v2871_v30  ;;  %v1431_v37 = vunpack.c.l.s8.bf16 %v1307_v32  ;;  %v1622_v32 = vrot.slane %v2151_v26, %v2784_v54 }
 0x5a9   :  { %1494 = vmatpush1.bf16.msra.mxu0 %v1394_v39  ;;  %1576 = vmatpush1.bf16.msra.mxu1 %v1396_v40  ;;  %v1308_v39 = vld [vmem:[#allocation4 + $0x1f0] sm:$0xff]  ;;  %v1430_v40 = vunpack.c.l.s8.bf16 %v1306_v38 }
 0x5aa   :  { %1495 = vmatprep.subr.bf16.mxu0 %v1399_v41  ;;  %1577 = vmatprep.subr.bf16.mxu1 %v1401_v43  ;;  %v1432_v41 = vunpack.c.l.s8.bf16 %v1308_v39  ;;  %v1236_v43 = vadd.f32 %v3044_v47, %v1067_v36  ;;  %v1436_v42 = vunpack.c.h.s8.bf16 %v1308_v39  ;;  %v2442_v47 = vld [vmem:[%s3194_s6] sm:$0xff]  }
 0x5ad   :  { %1496 = vmatpush1.bf16.msra.mxu0 %v1398_v45  ;;  %1578 = vmatpush1.bf16.msra.mxu1 %v1400_v48  ;;  %v1434_v45 = vunpack.c.h.s8.bf16 %v1306_v38  ;;  %v1244_v48 = vmax.f32 %v1236_v43, 0.0 }
 0x5ae   :  { %1497 = vmatprep.subr.bf16.mxu0 %v1403_v53  ;;  %1579 = vmatprep.subr.bf16.mxu1 %v1405_v3  ;;  %v2440_v53 = vld [vmem:[%s3194_s6 + $0x40] sm:$0xff]  }
 0x5af   :  { %v2441_v3 = vld [vmem:[%s3194_s6 + $0xc0] sm:$0xff]   ;;  %v1440_v56 = vpack.c.bf16 %v1244_v48, %v1244_v48 }
 0x5b1   :  { %1498 = vmatpush1.bf16.msra.mxu0 %v1402_v57  ;;  %1580 = vmatpush1.bf16.msra.mxu1 %v1404_v58  ;;  %v2444_v57 = vld [vmem:[%s3194_s6 + $0x48] sm:$0xff]  }
 0x5b2   :  { %1499 = vmatprep.subr.bf16.mxu0 %v1407_v59  ;;  %1581 = vmatprep.subr.bf16.mxu1 %v1409_v60  ;;  %v2445_v58 = vld [vmem:[%s3194_s6 + $0xc8] sm:$0xff]  }
 0x5b3   :  { %v2446_v59 = vld [vmem:[%s3194_s6 + $0x8] sm:$0xff]  }
 0x5b4   :  { %v2447_v60 = vld [vmem:[%s3194_s6 + $0x88] sm:$0xff]  }
 0x5b5   :  { %1500 = vmatpush1.bf16.msra.mxu0 %v1406_v63  ;;  %1582 = vmatpush1.bf16.msra.mxu1 %v1408_v1  ;;  %v2450_v63 = vld [vmem:[%s3194_s6 + $0x10] sm:$0xff]  }
 0x5b6   :  { %1501 = vmatprep.subr.bf16.mxu0 %v1411_v2  ;;  %1583 = vmatprep.subr.bf16.mxu1 %v1413_v4  ;;  %v2451_v1 = vld [vmem:[%s3194_s6 + $0x90] sm:$0xff]   ;;  %v2452_v2 = vld [vmem:[%s3194_s6 + $0x58] sm:$0xff]  }
 0x5b7   :  { %v2453_v4 = vld [vmem:[%s3194_s6 + $0xd8] sm:$0xff]  }
 0x5b9   :  { %1502 = vmatpush1.bf16.msra.mxu0 %v1410_v7  ;;  %1584 = vmatpush1.bf16.msra.mxu1 %v1412_v23  ;;  %v2456_v7 = vld [vmem:[%s3194_s6 + $0x60] sm:$0xff]  }
 0x5ba   :  { %1503 = vmatprep.subr.bf16.mxu0 %v1415_v8  ;;  %1585 = vmatprep.subr.bf16.mxu1 %v1417_v9  ;;  %v2457_v23 = vld [vmem:[%s3194_s6 + $0xe0] sm:$0xff]  }
 0x5bb   :  { %v2458_v8 = vld [vmem:[%s3194_s6 + $0x20] sm:$0xff]  }
 0x5bc   :  { %v2459_v9 = vld [vmem:[%s3194_s6 + $0xa0] sm:$0xff]  }
 0x5bd   :  { %1504 = vmatpush1.bf16.msra.mxu0 %v1414_v12  ;;  %1586 = vmatpush1.bf16.msra.mxu1 %v1416_v13  ;;  %v2462_v12 = vld [vmem:[%s3194_s6 + $0x28] sm:$0xff]  }
 0x5be   :  { %1505 = vmatprep.subr.bf16.mxu0 %v1419_v14  ;;  %1587 = vmatprep.subr.bf16.mxu1 %v1421_v15  ;;  %v2463_v13 = vld [vmem:[%s3194_s6 + $0xa8] sm:$0xff]   ;;  %v2464_v14 = vld [vmem:[%s3194_s6 + $0x70] sm:$0xff]  }
 0x5bf   :  { %v2465_v15 = vld [vmem:[%s3194_s6 + $0xf0] sm:$0xff]  }
 0x5c1   :  { %1506 = vmatpush1.bf16.msra.mxu0 %v1418_v18  ;;  %1588 = vmatpush1.bf16.msra.mxu1 %v1420_v20  ;;  %v2468_v18 = vld [vmem:[%s3194_s6 + $0x78] sm:$0xff]  }
 0x5c2   :  { %1507 = vmatprep.subr.bf16.mxu0 %v1423_v0  ;;  %1589 = vmatprep.subr.bf16.mxu1 %v1425_v22  ;;  %v2469_v20 = vld [vmem:[%s3194_s6 + $0xf8] sm:$0xff]  }
 0x5c3   :  { %v2470_v0 = vld [vmem:[%s3194_s6 + $0x38] sm:$0xff]  }
 0x5c4   :  { %v2471_v22 = vld [vmem:[%s3194_s6 + $0xb8] sm:$0xff]  }
 0x5c5   :  { %1508 = vmatpush1.bf16.msra.mxu0 %v1422_v27  ;;  %1590 = vmatpush1.bf16.msra.mxu1 %v1424_v28  ;;  %v2148_v27 = vld [vmem:[%s3196_s8 + $0x3] ss:$8 sm:$0xf]  ;;  %v1610_v28 = vrot.slane %v2151_v26, %v2771_v50 }
 0x5c6   :  { %1509 = vmatprep.subr.bf16.mxu0 %v1427_v29  ;;  %1591 = vmatprep.subr.bf16.mxu1 %v1429_v31  ;;  %v1618_v29 = vrot.slane %v2151_v26, %v2871_v30  ;;  %v1614_v31 = vrot.slane %v2151_v26, %v2779_v52  ;;  %v1635_v33 = vrot.slane %v2148_v27, %v2771_v50 }
 0x5c9   :  { %1510 = vmatpush1.bf16.msra.mxu0 %v1426_v34  ;;  %1592 = vmatpush1.bf16.msra.mxu1 %v1428_v35  ;;  %v1643_v34 = vrot.slane %v2148_v27, %v2871_v30 }
 0x5ca   :  { %1511 = vmatprep.subr.bf16.mxu0 %v1431_v37  ;;  %1593 = vmatprep.subr.bf16.mxu1 %v1433_v49  ;;  %v1639_v37 = vrot.slane %v2148_v27, %v2779_v52  ;;  %v1647_v49 = vrot.slane %v2148_v27, %v2784_v54  ;;  %v2037_v54 = vld [vmem:[%s3195_s7] sm:$0xf]  ;;  %s2556_s7 = smov 48  }
 0x5cd   :  { %1512 = vmatpush1.bf16.msra.mxu0 %v1430_v40  ;;  %1594 = vmatpush1.bf16.msra.mxu1 %v1432_v41 }
 0x5ce   :  { %1513 = vmatprep.subr.bf16.mxu0 %v1435_v51  ;;  %1595 = vmatprep.subr.bf16.mxu1 %v1437_v44 }
 0x5d1   :  { %1514 = vmatpush1.bf16.msra.mxu0 %v1434_v45  ;;  %1596 = vmatpush1.bf16.msra.mxu1 %v1436_v42 }
 0x5d2   :  { %2289 = vmatprep.subr.bf16.mxu0 %v2440_v53  ;;  %2311 = vmatprep.subr.bf16.mxu1 %v2441_v3 }
 0x5d4   :  { %1516 = vmatmul.mubr.bf16.vlgmr.msra.gmra.mrb[16].mxu0 %v1440_v56  ;;  %1598 = vmatmul.mubr.bf16.vlgmr.msra.gmra.mrb[16].mxu1 %v1440_v56 }
 0x5d5   :  { %2290 = vmatpush3.bf16.msra.mxu0 %v2442_v47  ;;  %2312 = vmatpush3.bf16.msra.mxu1 %v2443_v55 }
 0x5d6   :  { %2291 = vmatprep.subr.bf16.mxu0 %v2444_v57  ;;  %2313 = vmatprep.subr.bf16.mxu1 %v2445_v58 }
 0x5d9   :  { %2292 = vmatpush3.bf16.msra.mxu0 %v2446_v59  ;;  %2314 = vmatpush3.bf16.msra.mxu1 %v2447_v60 }
 0x5da   :  { %2293 = vmatprep.subr.bf16.mxu0 %v2448_v61  ;;  %2315 = vmatprep.subr.bf16.mxu1 %v2449_v62  ;;  %v2046_v61 = vsel %vm2044_vm4, %v2037_v54, 0  ;;  %v2036_v62 = vpack.c.bf16 %v3016_v46, %v3016_v46 }
 0x5dd   :  { %2294 = vmatpush3.bf16.msra.mxu0 %v2450_v63  ;;  %2316 = vmatpush3.bf16.msra.mxu1 %v2451_v1 }
 0x5de   :  { %2295 = vmatprep.subr.bf16.mxu0 %v2452_v2  ;;  %2317 = vmatprep.subr.bf16.mxu1 %v2453_v4 }
 0x5e1   :  { %2296 = vmatpush3.bf16.msra.mxu0 %v2454_v5  ;;  %2318 = vmatpush3.bf16.msra.mxu1 %v2455_v6 }
 0x5e2   :  { %2297 = vmatprep.subr.bf16.mxu0 %v2456_v7  ;;  %2319 = vmatprep.subr.bf16.mxu1 %v2457_v23 }
 0x5e5   :  { %2298 = vmatpush3.bf16.msra.mxu0 %v2458_v8  ;;  %2320 = vmatpush3.bf16.msra.mxu1 %v2459_v9 }
 0x5e6   :  { %2299 = vmatprep.subr.bf16.mxu0 %v2460_v10  ;;  %2321 = vmatprep.subr.bf16.mxu1 %v2461_v11 }
 0x5e9   :  { %2300 = vmatpush3.bf16.msra.mxu0 %v2462_v12  ;;  %2322 = vmatpush3.bf16.msra.mxu1 %v2463_v13  ;;  %v2039_v12 = vpop.permute.xlu0 %2038 }
 0x5ea   :  { %2301 = vmatprep.subr.bf16.mxu0 %v2464_v14  ;;  %2323 = vmatprep.subr.bf16.mxu1 %v2465_v15 }
 0x5ed   :  { %2302 = vmatpush3.bf16.msra.mxu0 %v2466_v16  ;;  %2324 = vmatpush3.bf16.msra.mxu1 %v2467_v17 }
 0x5ee   :  { %2303 = vmatprep.subr.bf16.mxu0 %v2468_v18  ;;  %2325 = vmatprep.subr.bf16.mxu1 %v2469_v20 }
 0x5f1   :  { %2304 = vmatpush3.bf16.msra.mxu0 %v2470_v0  ;;  %2326 = vmatpush3.bf16.msra.mxu1 %v2471_v22 }
 0x5f2   :  { %2335 = vmatprep.subr.bf16.mxu0 %v2554_v25 }
 0x6a7   :  { %v1517_v35 = vpop.f32.mrb[16].mxu0  ;;  %v1599_v36 = vpop.f32.mrb[16].mxu1 }
 0x6a8   :  { %v1627_v38 = vmul.f32 %v1610_v28, %v1517_v35  ;;  %v1629_v39 = vmul.f32 %v1618_v29, %v1599_v36  ;;  %v1519_v40 = vpop.f32.mrb[17].mxu0  ;;  %v1601_v41 = vpop.f32.mrb[17].mxu1 }
 0x6a9   :  { %v1628_v43 = vmul.f32 %v1614_v31, %v1519_v40  ;;  %v1630_v51 = vmul.f32 %v1622_v32, %v1601_v41  ;;  %v1521_v44 = vpop.f32.mrb[18].mxu0  ;;  %v1603_v45 = vpop.f32.mrb[18].mxu1 }
 0x6aa   :  { %v1652_v42 = vadd.f32 %v1635_v33, %v1627_v38  ;;  %v1654_v48 = vadd.f32 %v1643_v34, %v1629_v39  ;;  %v1522_v53 = vpop.f32.mrb[19].mxu0  ;;  %v1604_v50 = vpop.f32.mrb[19].mxu1 }
 0x6ab   :  { %v1653_v3 = vadd.f32 %v1639_v37, %v1628_v43  ;;  %v1655_v30 = vadd.f32 %v1647_v49, %v1630_v51 }
 0x6ac   :  { %v1656_v47 = vmax.f32 %v1652_v42, 0.0  ;;  %v1658_v55 = vmax.f32 %v1654_v48, 0.0 }
 0x6ad   :  { %v1657_v56 = vmax.f32 %v1653_v3, 0.0  ;;  %v1659_v52 = vmax.f32 %v1655_v30, 0.0 }
 0x6ae   :  { %v1660_v59 = vpack.c.bf16 %v1656_v47, %v1656_v47  ;;  %v1662_v60 = vpack.c.bf16 %v1658_v55, %v1658_v55  ;;  %v1004_v55 = vpop.xlane.xlu0 %1003 }
 0x6af   :  { %v1661_v57 = vpack.c.bf16 %v1657_v56, %v1657_v56  ;;  %v1663_v58 = vpack.c.bf16 %v1659_v52, %v1659_v52  ;;  %v2495_v52 = vld [vmem:[%s3188_s0] sm:$0xff] }
 0x6b1   :  { %1955 = vmatprep.mubr.bf16.mxu0 %v1661_v57  ;;  %1995 = vmatprep.mubr.bf16.mxu1 %v1663_v58 }
 0x6b2   :  { %1956 = vmatmul.mubr.bf16.vlgmr.msra.gmra.mrb[20].mxu0 %v1660_v59  ;;  %1996 = vmatmul.mubr.bf16.vlgmr.msra.gmra.mrb[20].mxu1 %v1662_v60 }
 0x6b3   :  { %2336 = vmatpush3.bf16.msra.mxu0 %v2046_v61  ;;  %2337 = vmatprep.mubr.msk.bf16.mxu0 %vm2555_vm5, %v2554_v25 }
 0x6ba   :  { %2338 = vmatmul.mubr.msk.bf16.vlgmr.msra.gmra.mrb[24].mxu0 %vm995_vm1, %v2036_v62 }
 0x785   :  { %v2305_v63 = vpop.f32.mrb[20].mxu0  ;;  %v2327_v1 = vpop.f32.mrb[20].mxu1 }
 0x786   :  { %v2306_v2 = vpop.f32.mrb[21].mxu0  ;;  %v2328_v4 = vpop.f32.mrb[21].mxu1 }
 0x787   :  { %v2307_v5 = vadd.f32 %v2306_v2, %v2305_v63  ;;  %v2329_v6 = vadd.f32 %v2328_v4, %v2327_v1  ;;  %v2308_v7 = vpop.f32.mrb[22].mxu0  ;;  %v2330_v23 = vpop.f32.mrb[22].mxu1 }
 0x788   :  { %v2309_v8 = vpop.f32.mrb[23].mxu0  ;;  %v2331_v9 = vpop.f32.mrb[23].mxu1 }
 0x789   :  { %v1958_v10 = vadd.f32 %v2307_v5, %v3026_v19 }
 0x78b   :  { %v3166_v11 = vadd.f32 %v2329_v6, %v1958_v10 }
 0x78d   :  { %v2004_v13 = vand.u32 2147483647, %v3166_v11  ;;  %v2082_v46 = vpop.f32.mrb[24].mxu0  ;;  %v2003_v34 = vmax.f32 %v3166_v11, 0.0 }
 0x78e   :  { %v2083_v14 = vadd.f32 %v2082_v46, %v2039_v12  ;;  %v2339_v15 = vpop.f32.mrb[25].mxu0 }
 0x78f   :  { %v2005_v16 = vsub.f32 0.0, %v2004_v13  ;;  %v2085_v17 = vpop.f32.mrb[26].mxu0 }
 0x790   :  { %v2340_v18 = vpop.f32.mrb[27].mxu0  ;;  %2112 = vrot.lane.b32.xlu0 %v2083_v14, %s2556_s7  ;;  %v2089_v0 = vand.u32 2147483647, %v2083_v14  ;;  %v2088_v30 = vmax.f32 %v2083_v14, 0.0 }
 0x791   :  { %v2006_v20 = vmul.f32 1.442695, %v2005_v16 }
 0x792   :  { %v2090_v19 = vsub.f32 0.0, %v2089_v0 }
 0x793   :  { %2482 = vpow2.f32 %v2006_v20 }
 0x794   :  { %v2091_v26 = vmul.f32 1.442695, %v2090_v19 }
 0x79d   :  { %v2483_v22 = vpop.eup %2482 }
 0x79e   :  { %v2008_v25 = vadd.f32 1.0, %v2483_v22  ;;  %v2011_v27 = vmul.f32 -0.5, %v2483_v22  ;;  %v2014_v29 = vand.u32 2147483647, %v2483_v22 }
 0x7a0   :  { %2484 = vlog2.f32 %v2008_v25  ;;  %v2012_v28 = vadd.f32 1.0, %v2011_v27  ;;  %vm2015_vm6 = vcmp.lt.f32.partialorder %v2014_v29, 0.0004427343 }
 0x7a1   :  { %2486 = vpow2.f32 %v2091_v26 }
 0x7a2   :  { %v2013_v33 = vmul.f32 %v2483_v22, %v2012_v28 }
 0x7aa   :  { %v2485_v31 = vpop.eup %2484 }
 0x7ab   :  { %v2010_v32 = vmul.f32 0.6931472, %v2485_v31  ;;  %v2487_v37 = vpop.eup %2486 }
 0x7ac   :  { %v2093_v38 = vadd.f32 1.0, %v2487_v37  ;;  %v2096_v43 = vmul.f32 -0.5, %v2487_v37  ;;  %v2099_v48 = vand.u32 2147483647, %v2487_v37 }
 0x7ad   :  { %v2016_v35 = vsel %vm2015_vm6, %v2013_v33, %v2010_v32 }
 0x7ae   :  { %v2017_v36 = vadd.f32 %v2016_v35, %v2003_v34  ;;  %v2097_v42 = vadd.f32 1.0, %v2096_v43  ;;  %vm2100_vm9 = vcmp.lt.f32.partialorder %v2099_v48, 0.0004427343 }
 0x7b0   :  { %v2018_v49 = vadd.f32 1e-10, %v2017_v36  ;;  %v2098_v50 = vmul.f32 %v2487_v37, %v2097_v42 }
 0x7b2   :  { %2488 = vrsqrt.f32 %v2018_v49  ;;  %vm2021_vm7 = vcmp.eq.f32.partialorder %v2018_v49, inf  ;;  %v2024_v41 = vand.u32 2147483648, %v2018_v49  ;;  %vm2023_vm8 = vcmp.eq.f32.partialorder %v2018_v49, 0.0 }
 0x7b3   :  { %2490 = vlog2.f32 %v2093_v38 }
 0x7b4   :  { %2492 = vrcp.f32 %v1004_v55 }
 0x7bc   :  { %v2489_v39 = vpop.eup %2488 }
 0x7bd   :  { %v2020_v40 = vmul.f32 %v2489_v39, %v2018_v49  ;;  %v2491_v45 = vpop.eup %2490 }
 0x7be   :  { %v2095_v53 = vmul.f32 0.6931472, %v2491_v45  ;;  %v2493_v57 = vpop.eup %2492 }
 0x7bf   :  { %v2022_v51 = vsel %vm2021_vm7, %v2018_v49, %v2020_v40  ;;  %v1006_v58 = vmul.f32 %v2493_v57, %v3029_v24 }
 0x7c0   :  { %v2025_v44 = vsel %vm2023_vm8, %v2024_v41, %v2022_v51  ;;  %v2101_v3 = vsel %vm2100_vm9, %v2098_v50, %v2095_v53 }
 0x7c1   :  { %2027 = vrot.lane.b32.xlu1 %v2025_v44, %s2557_s2  ;;  %v2102_v47 = vadd.f32 %v2101_v3, %v2088_v30 }
 0x7c5   :  { %2104 = vrot.lane.b32.xlu1 %v3166_v11, %s2546_s20 }
 0x7c9   :  { %2108 = vrot.lane.b32.xlu1 %v2017_v36, %s2546_s20 }
 0x7cd   :  { %2116 = vrot.lane.b32.xlu1 %v2102_v47, %s2556_s7 }
 0x802   :  { %v2113_v2 = vpop.permute.xlu0 %2112 }
 0x833   :  { %v2028_v56 = vpop.permute.xlu1 %2027 }
 0x834   :  { %v2030_v54 = vmul.f32 %v2495_v52, %v2028_v56 }
 0x836   :  { %2032 = vrot.lane.b32.xlu1 %v2030_v54, %s2552_s4 }
 0x837   :  { %v2105_v59 = vpop.permute.xlu1 %2104 }
 0x83a   :  { %2120 = vrot.lane.b32.xlu1 %v1006_v58, %s2558_s14 }
 0x83b   :  { %v2109_v60 = vpop.permute.xlu1 %2108 }
 0x83e   :  { %2124 = vrot.lane.b32.xlu1 %v3010_v21, %s2552_s4 }
 0x83f   :  { %v2117_v61 = vpop.permute.xlu1 %2116 }
 0x8a8   :  { %v2033_v62 = vpop.permute.xlu1 %2032 }
 0x8a9   :  { %v2035_v63 = vadd.f32 %v2033_v62, %v3166_v11 }
 0x8ab   :  { %v2128_v1 = vsel %vm2127_vm10, %v2035_v63, %v2105_v59 }
 0x8ac   :  { %v2129_v4 = vsel %vm145_vm0, %v2128_v1, %v2109_v60  ;;  %v2121_v5 = vpop.permute.xlu1 %2120 }
 0x8ad   :  { %v2131_v24 = vsel %vm2130_vm11, %v2129_v4, %v2113_v2 }
 0x8ae   :  { %v2132_v6 = vsel %vm1156_vm3, %v2131_v24, %v2117_v61 }
 0x8af   :  { %v2134_v7 = vsel %vm2133_vm12, %v2132_v6, %v2121_v5 }
 0x8b0   :  { %v2125_v21 = vpop.permute.xlu1 %2124 }
 0x8b1   :  { %v2136_v23 = vsel %vm2135_vm13, %v2134_v7, %v2125_v21 }
 0x8b2   :  { %v2138_v8 = vsel %vm2137_vm14, %v2136_v23, 0.0 }
 0x8b3   :  { %2139 = vst [vmem:[%s3197_s9] sm:$0xff] %v2138_v8 }
 0x8b4   :  { %2144 = vsyncpa [#allocation3], 1 }
 0x8b5   :  { %2145 = vsyncpa [#allocation5], 1 }

</bundles_post_ra>
